<compile_context>
chip_gen: v7x
topology: tpu7x:2x2x1
jax: 0.10.0
libtpu: 0.0.40
codegen_flags: <defaults>
</compile_context>

<pallas_src>
import math

import jax
import jax.numpy as jnp
from jax.experimental import pallas as pl
from jax.experimental.pallas import tpu as pltpu


# ---------------------------------------------------------------------------
# In-kernel helpers (operate on one (1, rows, W, C) block, f32 compute)
# ---------------------------------------------------------------------------
def _pointwise_conv_f32(x, w, b):
    """1x1 conv (with bias) as unrolled VPU FMAs.  x: (1, H, W, Cin) f32,
    w: (Cin, Cout) f32, b: (1, Cout) f32  ->  (1, H, W, Cout) f32.
    # TODO(synk): for large Cin use an MXU matmul on a flattened (rows, Cin) tile instead.
    """
    cin = x.shape[-1]
    cout = w.shape[-1]
    acc = jnp.zeros(x.shape[:-1] + (cout,), jnp.float32)
    for ci in range(cin):                       # static unroll; Cin is small for BiFPN laterals
        acc = acc + x[:, :, :, ci:ci + 1] * w[ci:ci + 1, :]
    return acc + b


def _upsample_rows(x, sh):
    """Nearest upsample along H by integer factor sh (W is already at output width).
    Leading-dim broadcast + reshape only (last two dims untouched -> no relayout)."""
    if sh == 1:
        return x
    n, hh, w, c = x.shape
    y = jnp.broadcast_to(x[:, :, None, :, :], (n, hh, sh, w, c))
    return y.reshape(n, hh * sh, w, c)


def _maxpool_down_2x(x_ref, halo_ref, conv_wb, scratch_ref, row_tile_idx):
    """Max-pool k=3, s=2, p=1 (the BiFPN 2x downsample) on one row tile.

    x_ref:      (1, 2*th, Wi, Cin)  rows [2*th*i, 2*th*(i+1)) of the (conv'd) input
    halo_ref:   (1, 1,   Wi, Cin)  input row (2*th*i - 1); ignored (-inf pad) for tile 0
    scratch_ref:(1, th,  Wi, Cfpn) f32 VMEM scratch
    returns     (1, th,  Wo, Cfpn) f32
    """
    _, th, wi, c = scratch_ref.shape
    wo = wi // 2

    x = x_ref[...].astype(jnp.float32)
    halo = halo_ref[...].astype(jnp.float32)
    if conv_wb is not None:                      # conv runs before the pool (module order)
        x = _pointwise_conv_f32(x, *conv_wb)
        halo = _pointwise_conv_f32(halo, *conv_wb)

    # --- vertical reduce: out row r uses input rows (2r-1, 2r, 2r+1) -------------------
    xr = x.reshape(1, th, 2, wi, c)              # leading-dim reshape only
    even = xr[:, :, 0]                           # rows 2r
    odd = xr[:, :, 1]                            # rows 2r+1
    # rows 2r-1: halo for r=0, odd[r-1] otherwise; the map's row -1 is -inf padding.
    scratch_ref[:, 0:1, :, :] = halo

    @pl.when(row_tile_idx == 0)
    def _():
        scratch_ref[:, 0:1, :, :] = jnp.full((1, 1, wi, c), -jnp.inf, jnp.float32)

    if th > 1:
        scratch_ref[:, 1:th, :, :] = odd[:, 0:th - 1]
    v = jnp.maximum(jnp.maximum(scratch_ref[...], even), odd)     # (1, th, Wi, C)

    # --- horizontal reduce: out col j uses cols (2j-1, 2j, 2j+1), vectorized ------------
    scratch_ref[...] = v
    ev = scratch_ref[:, :, pl.ds(0, wo, 2), :]                    # v[2j]
    od = scratch_ref[:, :, pl.ds(1, wo, 2), :]                    # v[2j+1]
    m = jnp.maximum(ev, od)
    if wo > 1:
        pr = scratch_ref[:, :, pl.ds(1, wo - 1, 2), :]            # v[2j-1], j >= 1
    # build the left-shifted term in the (now free) first Wo columns of the scratch
    scratch_ref[:, :, 0:1, :] = jnp.full((1, th, 1, c), -jnp.inf, jnp.float32)
    if wo > 1:
        scratch_ref[:, :, 1:wo, :] = pr
    return jnp.maximum(m, scratch_ref[:, :, 0:wo, :])


# ---------------------------------------------------------------------------
# Fused combine kernel builder
# ---------------------------------------------------------------------------
def _make_combine_kernel(node_meta, ow, cfpn, th):
    counts = [1 + (1 if m['mode'] == 'down' else 0) + (2 if m['has_conv'] else 0)
              for m in node_meta]
    n_in = 1 + sum(counts)                       # +1 for the SMEM edge-weight vector

    def kernel(*refs):
        nw_ref = refs[0]                         # (num_nodes,) f32 in SMEM
        out_ref = refs[n_in]
        scratch_refs = refs[n_in + 1:]
        row_idx = pl.program_id(1)

        acc = jnp.zeros((1, th, ow, cfpn), jnp.float32)   # f32 accumulation (bf16-safe)
        pos, si = 1, 0
        for k, meta in enumerate(node_meta):
            x_ref = refs[pos]; pos += 1
            halo_ref = None
            if meta['mode'] == 'down':
                halo_ref = refs[pos]; pos += 1
            conv_wb = None
            if meta['has_conv']:
                w_ref, b_ref = refs[pos], refs[pos + 1]
                pos += 2
                conv_wb = (w_ref[...].astype(jnp.float32),
                           b_ref[...].astype(jnp.float32))

            if meta['mode'] == 'down':
                blk = _maxpool_down_2x(x_ref, halo_ref, conv_wb, scratch_refs[si], row_idx)
                si += 1
            elif meta['mode'] == 'up':
                blk = x_ref[...].astype(jnp.float32)
                if conv_wb is not None:
                    blk = _pointwise_conv_f32(blk, *conv_wb)
                blk = _upsample_rows(blk, meta['sh'])
            else:                                # same resolution
                blk = x_ref[...].astype(jnp.float32)
                if conv_wb is not None:
                    blk = _pointwise_conv_f32(blk, *conv_wb)

            acc = acc + nw_ref[k] * blk

        out_ref[...] = acc.astype(out_ref.dtype)

    return kernel


def _pick_row_tile(oh, ow, cfpn, node_meta, itemsize, budget_bytes=8 * 1024 * 1024):
    """Largest divisor of the output height that is a multiple of every upsample scale and
    keeps the per-grid-step VMEM footprint (double-buffered blocks + scratch) under budget.
    Budget is conservative so production shapes fit v7x's 64 MiB VMEM."""
    lcm = 1
    for m in node_meta:
        if m['mode'] == 'up':
            lcm = lcm * m['sh'] // math.gcd(lcm, m['sh'])

    def step_bytes(t):
        total = 2 * t * ow * cfpn * itemsize                          # output block
        for m in node_meta:
            if m['mode'] == 'same':
                total += 2 * t * ow * m['cin'] * itemsize
            elif m['mode'] == 'down':
                total += 2 * 2 * t * m['iw'] * m['cin'] * itemsize    # main block
                total += 2 * m['iw'] * m['cin'] * itemsize            # halo row
                total += t * m['iw'] * cfpn * 4                       # f32 scratch
            else:
                total += 2 * (t // m['sh']) * ow * m['cin'] * itemsize
            if m['has_conv']:
                total += 2 * (m['cin'] + 1) * cfpn * itemsize
        return total

    cands = [t for t in range(oh, 0, -1) if oh % t == 0 and t % lcm == 0]
    for t in cands:
        if step_bytes(t) <= budget_bytes:
            return t
    return cands[-1]


# ---------------------------------------------------------------------------
# FpnCombine.forward (NHWC core + NCHW module-facing wrapper)
# ---------------------------------------------------------------------------
def fpn_combine_nhwc(xs_nhwc, feature_info, inputs_offsets, output_size,
                     fpn_channels, conv_params, edge_weights,
                     weight_method='attn', row_tile=None,
                     vmem_limit_bytes=32 * 1024 * 1024):
    oh, ow = output_size
    dtype = xs_nhwc[0].dtype
    n = xs_nhwc[inputs_offsets[0]].shape[0]
    itemsize = jnp.dtype(dtype).itemsize

    # ---- static per-node metadata ---------------------------------------------------
    node_meta = []
    for offset in inputs_offsets:
        info = feature_info[offset]
        ih, iw = info['size']
        cin = info['num_chs']
        has_conv = cin != fpn_channels
        if ih > oh and iw > ow:
            assert ih == 2 * oh and iw == 2 * ow, \
                'only the 2x (kernel=3, stride=2, pad=1) BiFPN max-pool downsample is implemented'
            mode, sh, sw = 'down', 2, 2
        elif ih < oh or iw < ow:
            assert oh % ih == 0 and ow % iw == 0, 'nearest upsample needs integer scale'
            mode, sh, sw = 'up', oh // ih, ow // iw
        else:
            assert (ih, iw) == (oh, ow)
            mode, sh, sw = 'same', 1, 1
        node_meta.append(dict(offset=offset, mode=mode, has_conv=has_conv,
                              cin=cin, ih=ih, iw=iw, sh=sh, sw=sw))

    # ---- row tile (per-generation VMEM sizing) ----------------------------------------
    th = row_tile if row_tile is not None else _pick_row_tile(oh, ow, fpn_channels,
                                                              node_meta, itemsize)
    assert oh % th == 0
    for meta in node_meta:
        if meta['mode'] == 'up':
            assert th % meta['sh'] == 0

    # ---- edge-weight normalization (tiny parameter glue, computed in f32) -------------
    ew = edge_weights.astype(jnp.float32)
    if weight_method == 'attn':
        nw = jax.nn.softmax(ew)
    elif weight_method == 'fastattn':
        ew = jax.nn.relu(ew)
        nw = ew / (jnp.sum(ew) + 0.0001)
    elif weight_method == 'sum':
        nw = jnp.ones((len(inputs_offsets),), jnp.float32)
    else:
        raise ValueError('unknown weight_method {}'.format(weight_method))

    # ---- assemble the single fused pallas_call ----------------------------------------
    args = [nw]
    in_specs = [pl.BlockSpec(memory_space=pltpu.MemorySpace.SMEM)]
    scratch_shapes = []
    for meta in node_meta:
        x = xs_nhwc[meta['offset']]
        cin = meta['cin']
        if meta['mode'] == 'same':
            args.append(x)
            in_specs.append(pl.BlockSpec((1, th, ow, cin), lambda n_, i_: (n_, i_, 0, 0)))
        elif meta['mode'] == 'down':
            iw = meta['iw']
            args.append(x)
            in_specs.append(pl.BlockSpec((1, 2 * th, iw, cin),
                                         lambda n_, i_: (n_, i_, 0, 0)))
            # 1-row halo: input row (2*th*i - 1), clamped; masked to -inf on the first tile.
            args.append(x)
            in_specs.append(pl.BlockSpec(
                (1, 1, iw, cin),
                lambda n_, i_, _t=th: (n_, jnp.maximum(2 * _t * i_ - 1, 0), 0, 0)))
            scratch_shapes.append(pltpu.VMEM((1, th, iw, fpn_channels), jnp.float32))
        else:  # 'up'
            sh, sw = meta['sh'], meta['sw']
            # TODO(synk): fuse the W-axis nearest repeat too (strided sublane stores); only the
            #             small coarse map's W repeat is left to XLA here.
            xw = jnp.repeat(x, sw, axis=2) if sw > 1 else x
            args.append(xw)
            in_specs.append(pl.BlockSpec((1, th // sh, ow, cin),
                                         lambda n_, i_: (n_, i_, 0, 0)))
        if meta['has_conv']:
            w, b = conv_params[meta['offset']]
            assert w.shape == (cin, fpn_channels)
            args += [w, jnp.reshape(b, (1, fpn_channels))]
            in_specs += [
                pl.BlockSpec((cin, fpn_channels), lambda n_, i_: (0, 0)),
                pl.BlockSpec((1, fpn_channels), lambda n_, i_: (0, 0)),
            ]

    kernel = _make_combine_kernel(node_meta, ow, fpn_channels, th)

    return pl.pallas_call(
        kernel,
        out_shape=jax.ShapeDtypeStruct((n, oh, ow, fpn_channels), dtype),
        grid=(n, oh // th),
        in_specs=in_specs,
        out_specs=pl.BlockSpec((1, th, ow, fpn_channels), lambda n_, i_: (n_, i_, 0, 0)),
        scratch_shapes=scratch_shapes,
        compiler_params=pltpu.CompilerParams(
            dimension_semantics=('parallel', 'parallel'),
            vmem_limit_bytes=vmem_limit_bytes),
    )(*args)


def fpn_combine(xs_nchw, feature_info, inputs_offsets, output_size,
                fpn_channels, conv_params, edge_weights, weight_method='attn'):
    """Module-facing (NCHW in / NCHW out) FpnCombine.forward."""
    xs_nhwc = list(xs_nchw)
    for off in set(inputs_offsets):
        xs_nhwc[off] = jnp.transpose(xs_nchw[off], (0, 2, 3, 1))
    out = fpn_combine_nhwc(xs_nhwc, feature_info, inputs_offsets, output_size,
                           fpn_channels, conv_params, edge_weights, weight_method)
    return jnp.transpose(out, (0, 3, 1, 2))


# ---------------------------------------------------------------------------
# Pure-JAX reference (correctness check only)
# ---------------------------------------------------------------------------
def fpn_combine_reference(xs_nchw, feature_info, inputs_offsets, output_size,
                          fpn_channels, conv_params, edge_weights, weight_method='attn'):
    dtype = xs_nchw[0].dtype
    oh, ow = output_size
    nodes = []
    for offset in inputs_offsets:
        x = jnp.transpose(xs_nchw[offset], (0, 2, 3, 1)).astype(jnp.float32)
        info = feature_info[offset]
        if info['num_chs'] != fpn_channels:
            w, b = conv_params[offset]
            x = jnp.einsum('nhwi,io->nhwo', x, w.astype(jnp.float32)) + b.astype(jnp.float32)
        ih, iw = info['size']
        if ih > oh and iw > ow:
            x = jax.lax.reduce_window(
                x, -jnp.inf, jax.lax.max,
                window_dimensions=(1, 3, 3, 1), window_strides=(1, 2, 2, 1),
                padding=((0, 0), (1, 1), (1, 1), (0, 0)))
        elif ih < oh or iw < ow:
            x = jnp.repeat(jnp.repeat(x, oh // ih, axis=1), ow // iw, axis=2)
        nodes.append(x)
    ew = edge_weights.astype(jnp.float32)
    if weight_method == 'attn':
        nw = jax.nn.softmax(ew)
    elif weight_method == 'fastattn':
        ew = jax.nn.relu(ew)
        nw = ew / (jnp.sum(ew) + 0.0001)
    else:
        nw = jnp.ones((len(nodes),), jnp.float32)
    out = sum(nodes[i] * nw[i] for i in range(len(nodes))).astype(dtype)
    return jnp.transpose(out, (0, 3, 1, 2))


if __name__ == "__main__":
    key = jax.random.PRNGKey(0)
    k = jax.random.split(key, 6)

    fpn_channels = 64
    output_size = (8, 8)
    inputs_offsets = (0, 1, 2)
    feature_info = [
        {'num_chs': 8,  'size': (8, 8)},    # lateral input: 1x1 channel projection only
        {'num_chs': 64, 'size': (16, 16)},  # finer level:   3x3/s2 max-pool downsample
        {'num_chs': 64, 'size': (4, 4)},    # coarser level: 2x nearest upsample
    ]

    # PyTorch-convention NCHW inputs.
    xs = [
        jax.random.normal(k[0], (2, 8, 8, 8), jnp.float32),
        jax.random.normal(k[1], (2, 64, 16, 16), jnp.float32),
        jax.random.normal(k[2], (2, 64, 4, 4), jnp.float32),
    ]

    # ResampleFeatureMap['0'].conv: 1x1 conv 8 -> 64, bias=True (apply_bn=False).
    # Weight stored as (Cin, Cout) == PyTorch (Cout, Cin, 1, 1) transposed.
    conv_params = {
        0: (0.1 * jax.random.normal(k[3], (8, fpn_channels), jnp.float32),
            0.1 * jax.random.normal(k[4], (fpn_channels,), jnp.float32)),
    }
    # Module init is nn.Parameter(torch.ones(...)); randomized deterministically so the
    # softmax weighting is non-trivial.
    edge_weights = jax.random.normal(k[5], (len(inputs_offsets),), jnp.float32)

    out = fpn_combine(xs, feature_info, inputs_offsets, output_size,
                      fpn_channels, conv_params, edge_weights)
    out = jax.block_until_ready(out)

    ref = fpn_combine_reference(xs, feature_info, inputs_offsets, output_size,
                                fpn_channels, conv_params, edge_weights)

    assert out.shape == (2, fpn_channels) + output_size, out.shape
    assert jnp.allclose(out, ref, rtol=1e-5, atol=1e-5), \
        float(jnp.max(jnp.abs(out - ref)))
    print("KERNEL_OK")
</pallas_src>

<mosaic_0001>
module attributes {stable_mosaic.version = 11 : i64} {
  func.func @kernel(%arg0: i32, %arg1: i32, %arg2: memref<3xf32, #tpu.memory_space<smem>>, %arg3: memref<1x8x8x8xf32, #tpu.memory_space<vmem>>, %arg4: memref<8x64xf32, #tpu.memory_space<vmem>>, %arg5: memref<1x64xf32, #tpu.memory_space<vmem>>, %arg6: memref<1x16x16x64xf32, #tpu.memory_space<vmem>>, %arg7: memref<1x1x16x64xf32, #tpu.memory_space<vmem>>, %arg8: memref<1x4x8x64xf32, #tpu.memory_space<vmem>>, %arg9: memref<1x8x8x64xf32, #tpu.memory_space<vmem>>, %arg10: memref<1x8x16x64xf32, #tpu.memory_space<vmem>>) attributes {dimension_semantics = [#tpu.dimension_semantics<parallel>, #tpu.dimension_semantics<parallel>], iteration_bounds = array<i64: 2, 1>, scalar_prefetch = 0 : i64, scratch_operands = 1 : i64, tpu.core_type = #tpu.core_type<tc>, window_params = [{transform_indices = @transform_0, window_bounds = array<i64: 3>}, {transform_indices = @transform_1, window_bounds = array<i64: 1, 8, 8, 8>}, {pipeline_mode = #tpu.pipeline_mode<synchronous>, transform_indices = @transform_2, window_bounds = array<i64: 8, 64>}, {pipeline_mode = #tpu.pipeline_mode<synchronous>, transform_indices = @transform_3, window_bounds = array<i64: 1, 64>}, {transform_indices = @transform_4, window_bounds = array<i64: 1, 16, 16, 64>}, {transform_indices = @transform_5, window_bounds = array<i64: 1, 1, 16, 64>}, {transform_indices = @transform_6, window_bounds = array<i64: 1, 4, 8, 64>}, {transform_indices = @transform_7, window_bounds = array<i64: 1, 8, 8, 64>}]} {
    %cst = arith.constant 0.000000e+00 : f32
    %0 = vector.broadcast %cst : f32 to vector<1x8x8x64xf32>
    %c0 = arith.constant 0 : index
    %c0_0 = arith.constant 0 : index
    %1 = vector.load %arg4[%c0, %c0_0] : memref<8x64xf32, #tpu.memory_space<vmem>>, vector<8x64xf32>
    %c0_1 = arith.constant 0 : index
    %c0_2 = arith.constant 0 : index
    %2 = vector.load %arg5[%c0_1, %c0_2] : memref<1x64xf32, #tpu.memory_space<vmem>>, vector<1x64xf32>
    %c0_3 = arith.constant 0 : index
    %c0_4 = arith.constant 0 : index
    %c0_5 = arith.constant 0 : index
    %c0_6 = arith.constant 0 : index
    %3 = vector.load %arg3[%c0_3, %c0_4, %c0_5, %c0_6] : memref<1x8x8x8xf32, #tpu.memory_space<vmem>>, vector<1x8x8x8xf32>
    %cst_7 = arith.constant 0.000000e+00 : f32
    %4 = vector.broadcast %cst_7 : f32 to vector<1x8x8x64xf32>
    %5 = vector.extract_strided_slice %3 {offsets = [0, 0, 0, 0], sizes = [1, 8, 8, 1], strides = [1, 1, 1, 1]} : vector<1x8x8x8xf32> to vector<1x8x8x1xf32>
    %6 = vector.extract_strided_slice %1 {offsets = [0, 0], sizes = [1, 64], strides = [1, 1]} : vector<8x64xf32> to vector<1x64xf32>
    %7 = vector.shape_cast %6 : vector<1x64xf32> to vector<1x1x1x64xf32>
    %8 = vector.broadcast %5 : vector<1x8x8x1xf32> to vector<1x8x8x64xf32>
    %9 = vector.broadcast %7 : vector<1x1x1x64xf32> to vector<1x8x8x64xf32>
    %10 = arith.mulf %8, %9 : vector<1x8x8x64xf32>
    %11 = arith.addf %4, %10 : vector<1x8x8x64xf32>
    %12 = vector.extract_strided_slice %3 {offsets = [0, 0, 0, 1], sizes = [1, 8, 8, 1], strides = [1, 1, 1, 1]} : vector<1x8x8x8xf32> to vector<1x8x8x1xf32>
    %13 = vector.extract_strided_slice %1 {offsets = [1, 0], sizes = [1, 64], strides = [1, 1]} : vector<8x64xf32> to vector<1x64xf32>
    %14 = vector.shape_cast %13 : vector<1x64xf32> to vector<1x1x1x64xf32>
    %15 = vector.broadcast %12 : vector<1x8x8x1xf32> to vector<1x8x8x64xf32>
    %16 = vector.broadcast %14 : vector<1x1x1x64xf32> to vector<1x8x8x64xf32>
    %17 = arith.mulf %15, %16 : vector<1x8x8x64xf32>
    %18 = arith.addf %11, %17 : vector<1x8x8x64xf32>
    %19 = vector.extract_strided_slice %3 {offsets = [0, 0, 0, 2], sizes = [1, 8, 8, 1], strides = [1, 1, 1, 1]} : vector<1x8x8x8xf32> to vector<1x8x8x1xf32>
    %20 = vector.extract_strided_slice %1 {offsets = [2, 0], sizes = [1, 64], strides = [1, 1]} : vector<8x64xf32> to vector<1x64xf32>
    %21 = vector.shape_cast %20 : vector<1x64xf32> to vector<1x1x1x64xf32>
    %22 = vector.broadcast %19 : vector<1x8x8x1xf32> to vector<1x8x8x64xf32>
    %23 = vector.broadcast %21 : vector<1x1x1x64xf32> to vector<1x8x8x64xf32>
    %24 = arith.mulf %22, %23 : vector<1x8x8x64xf32>
    %25 = arith.addf %18, %24 : vector<1x8x8x64xf32>
    %26 = vector.extract_strided_slice %3 {offsets = [0, 0, 0, 3], sizes = [1, 8, 8, 1], strides = [1, 1, 1, 1]} : vector<1x8x8x8xf32> to vector<1x8x8x1xf32>
    %27 = vector.extract_strided_slice %1 {offsets = [3, 0], sizes = [1, 64], strides = [1, 1]} : vector<8x64xf32> to vector<1x64xf32>
    %28 = vector.shape_cast %27 : vector<1x64xf32> to vector<1x1x1x64xf32>
    %29 = vector.broadcast %26 : vector<1x8x8x1xf32> to vector<1x8x8x64xf32>
    %30 = vector.broadcast %28 : vector<1x1x1x64xf32> to vector<1x8x8x64xf32>
    %31 = arith.mulf %29, %30 : vector<1x8x8x64xf32>
    %32 = arith.addf %25, %31 : vector<1x8x8x64xf32>
    %33 = vector.extract_strided_slice %3 {offsets = [0, 0, 0, 4], sizes = [1, 8, 8, 1], strides = [1, 1, 1, 1]} : vector<1x8x8x8xf32> to vector<1x8x8x1xf32>
    %34 = vector.extract_strided_slice %1 {offsets = [4, 0], sizes = [1, 64], strides = [1, 1]} : vector<8x64xf32> to vector<1x64xf32>
    %35 = vector.shape_cast %34 : vector<1x64xf32> to vector<1x1x1x64xf32>
    %36 = vector.broadcast %33 : vector<1x8x8x1xf32> to vector<1x8x8x64xf32>
    %37 = vector.broadcast %35 : vector<1x1x1x64xf32> to vector<1x8x8x64xf32>
    %38 = arith.mulf %36, %37 : vector<1x8x8x64xf32>
    %39 = arith.addf %32, %38 : vector<1x8x8x64xf32>
    %40 = vector.extract_strided_slice %3 {offsets = [0, 0, 0, 5], sizes = [1, 8, 8, 1], strides = [1, 1, 1, 1]} : vector<1x8x8x8xf32> to vector<1x8x8x1xf32>
    %41 = vector.extract_strided_slice %1 {offsets = [5, 0], sizes = [1, 64], strides = [1, 1]} : vector<8x64xf32> to vector<1x64xf32>
    %42 = vector.shape_cast %41 : vector<1x64xf32> to vector<1x1x1x64xf32>
    %43 = vector.broadcast %40 : vector<1x8x8x1xf32> to vector<1x8x8x64xf32>
    %44 = vector.broadcast %42 : vector<1x1x1x64xf32> to vector<1x8x8x64xf32>
    %45 = arith.mulf %43, %44 : vector<1x8x8x64xf32>
    %46 = arith.addf %39, %45 : vector<1x8x8x64xf32>
    %47 = vector.extract_strided_slice %3 {offsets = [0, 0, 0, 6], sizes = [1, 8, 8, 1], strides = [1, 1, 1, 1]} : vector<1x8x8x8xf32> to vector<1x8x8x1xf32>
    %48 = vector.extract_strided_slice %1 {offsets = [6, 0], sizes = [1, 64], strides = [1, 1]} : vector<8x64xf32> to vector<1x64xf32>
    %49 = vector.shape_cast %48 : vector<1x64xf32> to vector<1x1x1x64xf32>
    %50 = vector.broadcast %47 : vector<1x8x8x1xf32> to vector<1x8x8x64xf32>
    %51 = vector.broadcast %49 : vector<1x1x1x64xf32> to vector<1x8x8x64xf32>
    %52 = arith.mulf %50, %51 : vector<1x8x8x64xf32>
    %53 = arith.addf %46, %52 : vector<1x8x8x64xf32>
    %54 = vector.extract_strided_slice %3 {offsets = [0, 0, 0, 7], sizes = [1, 8, 8, 1], strides = [1, 1, 1, 1]} : vector<1x8x8x8xf32> to vector<1x8x8x1xf32>
    %55 = vector.extract_strided_slice %1 {offsets = [7, 0], sizes = [1, 64], strides = [1, 1]} : vector<8x64xf32> to vector<1x64xf32>
    %56 = vector.shape_cast %55 : vector<1x64xf32> to vector<1x1x1x64xf32>
    %57 = vector.broadcast %54 : vector<1x8x8x1xf32> to vector<1x8x8x64xf32>
    %58 = vector.broadcast %56 : vector<1x1x1x64xf32> to vector<1x8x8x64xf32>
    %59 = arith.mulf %57, %58 : vector<1x8x8x64xf32>
    %60 = arith.addf %53, %59 : vector<1x8x8x64xf32>
    %61 = vector.shape_cast %2 : vector<1x64xf32> to vector<1x1x1x64xf32>
    %62 = vector.broadcast %61 : vector<1x1x1x64xf32> to vector<1x8x8x64xf32>
    %63 = arith.addf %60, %62 : vector<1x8x8x64xf32>
    %c0_8 = arith.constant 0 : index
    %64 = memref.load %arg2[%c0_8] : memref<3xf32, #tpu.memory_space<smem>>
    %65 = vector.broadcast %64 : f32 to vector<1x8x8x64xf32>
    %66 = arith.mulf %65, %63 : vector<1x8x8x64xf32>
    %67 = arith.addf %0, %66 : vector<1x8x8x64xf32>
    %c0_9 = arith.constant 0 : index
    %c0_10 = arith.constant 0 : index
    %c0_11 = arith.constant 0 : index
    %c0_12 = arith.constant 0 : index
    %68 = vector.load %arg6[%c0_9, %c0_10, %c0_11, %c0_12] : memref<1x16x16x64xf32, #tpu.memory_space<vmem>>, vector<1x16x16x64xf32>
    %c0_13 = arith.constant 0 : index
    %c0_14 = arith.constant 0 : index
    %c0_15 = arith.constant 0 : index
    %c0_16 = arith.constant 0 : index
    %69 = vector.load %arg7[%c0_13, %c0_14, %c0_15, %c0_16] : memref<1x1x16x64xf32, #tpu.memory_space<vmem>>, vector<1x1x16x64xf32>
    %70 = vector.shape_cast %68 : vector<1x16x16x64xf32> to vector<1x8x2x16x64xf32>
    %71 = vector.extract_strided_slice %70 {offsets = [0, 0, 0, 0, 0], sizes = [1, 8, 1, 16, 64], strides = [1, 1, 1, 1, 1]} : vector<1x8x2x16x64xf32> to vector<1x8x1x16x64xf32>
    %72 = vector.shape_cast %71 : vector<1x8x1x16x64xf32> to vector<1x8x16x64xf32>
    %73 = vector.extract_strided_slice %70 {offsets = [0, 0, 1, 0, 0], sizes = [1, 8, 1, 16, 64], strides = [1, 1, 1, 1, 1]} : vector<1x8x2x16x64xf32> to vector<1x8x1x16x64xf32>
    %74 = vector.shape_cast %73 : vector<1x8x1x16x64xf32> to vector<1x8x16x64xf32>
    %c0_17 = arith.constant 0 : index
    %c0_18 = arith.constant 0 : index
    %c0_19 = arith.constant 0 : index
    %c0_20 = arith.constant 0 : index
    %75 = vector.load %arg10[%c0_17, %c0_18, %c0_19, %c0_20] : memref<1x8x16x64xf32, #tpu.memory_space<vmem>>, vector<1x1x16x64xf32>
    tpu.vector_store %arg10[%c0_17, %c0_18, %c0_19, %c0_20], %69 {strides = array<i32>} : memref<1x8x16x64xf32, #tpu.memory_space<vmem>>, vector<1x1x16x64xf32>,
    %c0_i32 = arith.constant 0 : i32
    %76 = arith.cmpi eq, %arg1, %c0_i32 : i32
    %77 = arith.extui %76 : i1 to i32
    %c0_i32_21 = arith.constant 0 : i32
    %78 = arith.cmpi ne, %77, %c0_i32_21 : i32
    scf.if %78 {
      %cst_67 = arith.constant 0xFF800000 : f32
      %108 = vector.broadcast %cst_67 : f32 to vector<1x1x16x64xf32>
      %c0_68 = arith.constant 0 : index
      %c0_69 = arith.constant 0 : index
      %c0_70 = arith.constant 0 : index
      %c0_71 = arith.constant 0 : index
      %109 = vector.load %arg10[%c0_68, %c0_69, %c0_70, %c0_71] : memref<1x8x16x64xf32, #tpu.memory_space<vmem>>, vector<1x1x16x64xf32>
      tpu.vector_store %arg10[%c0_68, %c0_69, %c0_70, %c0_71], %108 {strides = array<i32>} : memref<1x8x16x64xf32, #tpu.memory_space<vmem>>, vector<1x1x16x64xf32>,
    } else {
    }
    %79 = vector.extract_strided_slice %74 {offsets = [0, 0, 0, 0], sizes = [1, 7, 16, 64], strides = [1, 1, 1, 1]} : vector<1x8x16x64xf32> to vector<1x7x16x64xf32>
    %c0_22 = arith.constant 0 : index
    %c1 = arith.constant 1 : index
    %c0_23 = arith.constant 0 : index
    %c0_24 = arith.constant 0 : index
    %80 = vector.load %arg10[%c0_22, %c1, %c0_23, %c0_24] : memref<1x8x16x64xf32, #tpu.memory_space<vmem>>, vector<1x7x16x64xf32>
    tpu.vector_store %arg10[%c0_22, %c1, %c0_23, %c0_24], %79 {strides = array<i32>} : memref<1x8x16x64xf32, #tpu.memory_space<vmem>>, vector<1x7x16x64xf32>,
    %c0_25 = arith.constant 0 : index
    %c0_26 = arith.constant 0 : index
    %c0_27 = arith.constant 0 : index
    %c0_28 = arith.constant 0 : index
    %81 = vector.load %arg10[%c0_25, %c0_26, %c0_27, %c0_28] : memref<1x8x16x64xf32, #tpu.memory_space<vmem>>, vector<1x8x16x64xf32>
    %82 = arith.maximumf %81, %72 : vector<1x8x16x64xf32>
    %83 = arith.maximumf %82, %74 : vector<1x8x16x64xf32>
    %c0_29 = arith.constant 0 : index
    %c0_30 = arith.constant 0 : index
    %c0_31 = arith.constant 0 : index
    %c0_32 = arith.constant 0 : index
    %84 = vector.load %arg10[%c0_29, %c0_30, %c0_31, %c0_32] : memref<1x8x16x64xf32, #tpu.memory_space<vmem>>, vector<1x8x16x64xf32>
    tpu.vector_store %arg10[%c0_29, %c0_30, %c0_31, %c0_32], %83 {strides = array<i32>} : memref<1x8x16x64xf32, #tpu.memory_space<vmem>>, vector<1x8x16x64xf32>,
    %c0_33 = arith.constant 0 : index
    %c0_34 = arith.constant 0 : index
    %c0_35 = arith.constant 0 : index
    %c0_36 = arith.constant 0 : index
    %85 = tpu.strided_load %arg10[%c0_33, %c0_34, %c0_35, %c0_36] {strides = array<i32: 1, 1, 2, 1>} : memref<1x8x16x64xf32, #tpu.memory_space<vmem>>, vector<1x8x8x64xf32>
    %c0_37 = arith.constant 0 : index
    %c0_38 = arith.constant 0 : index
    %c1_39 = arith.constant 1 : index
    %c0_40 = arith.constant 0 : index
    %86 = tpu.strided_load %arg10[%c0_37, %c0_38, %c1_39, %c0_40] {strides = array<i32: 1, 1, 2, 1>} : memref<1x8x16x64xf32, #tpu.memory_space<vmem>>, vector<1x8x8x64xf32>
    %87 = arith.maximumf %85, %86 : vector<1x8x8x64xf32>
    %c0_41 = arith.constant 0 : index
    %c0_42 = arith.constant 0 : index
    %c1_43 = arith.constant 1 : index
    %c0_44 = arith.constant 0 : index
    %88 = tpu.strided_load %arg10[%c0_41, %c0_42, %c1_43, %c0_44] {strides = array<i32: 1, 1, 2, 1>} : memref<1x8x16x64xf32, #tpu.memory_space<vmem>>, vector<1x8x7x64xf32>
    %cst_45 = arith.constant 0xFF800000 : f32
    %89 = vector.broadcast %cst_45 : f32 to vector<1x8x1x64xf32>
    %c0_46 = arith.constant 0 : index
    %c0_47 = arith.constant 0 : index
    %c0_48 = arith.constant 0 : index
    %c0_49 = arith.constant 0 : index
    %90 = vector.load %arg10[%c0_46, %c0_47, %c0_48, %c0_49] : memref<1x8x16x64xf32, #tpu.memory_space<vmem>>, vector<1x8x1x64xf32>
    tpu.vector_store %arg10[%c0_46, %c0_47, %c0_48, %c0_49], %89 {strides = array<i32>} : memref<1x8x16x64xf32, #tpu.memory_space<vmem>>, vector<1x8x1x64xf32>,
    %c0_50 = arith.constant 0 : index
    %c0_51 = arith.constant 0 : index
    %c1_52 = arith.constant 1 : index
    %c0_53 = arith.constant 0 : index
    %91 = vector.load %arg10[%c0_50, %c0_51, %c1_52, %c0_53] : memref<1x8x16x64xf32, #tpu.memory_space<vmem>>, vector<1x8x7x64xf32>
    tpu.vector_store %arg10[%c0_50, %c0_51, %c1_52, %c0_53], %88 {strides = array<i32>} : memref<1x8x16x64xf32, #tpu.memory_space<vmem>>, vector<1x8x7x64xf32>,
    %c0_54 = arith.constant 0 : index
    %c0_55 = arith.constant 0 : index
    %c0_56 = arith.constant 0 : index
    %c0_57 = arith.constant 0 : index
    %92 = vector.load %arg10[%c0_54, %c0_55, %c0_56, %c0_57] : memref<1x8x16x64xf32, #tpu.memory_space<vmem>>, vector<1x8x8x64xf32>
    %93 = arith.maximumf %87, %92 : vector<1x8x8x64xf32>
    %c1_58 = arith.constant 1 : index
    %94 = memref.load %arg2[%c1_58] : memref<3xf32, #tpu.memory_space<smem>>
    %95 = vector.broadcast %94 : f32 to vector<1x8x8x64xf32>
    %96 = arith.mulf %95, %93 : vector<1x8x8x64xf32>
    %97 = arith.addf %67, %96 : vector<1x8x8x64xf32>
    %c0_59 = arith.constant 0 : index
    %c0_60 = arith.constant 0 : index
    %c0_61 = arith.constant 0 : index
    %c0_62 = arith.constant 0 : index
    %98 = vector.load %arg8[%c0_59, %c0_60, %c0_61, %c0_62] : memref<1x4x8x64xf32, #tpu.memory_space<vmem>>, vector<1x4x8x64xf32>
    %99 = vector.shape_cast %98 : vector<1x4x8x64xf32> to vector<1x4x1x8x64xf32>
    %100 = vector.shape_cast %99 : vector<1x4x1x8x64xf32> to vector<1x4x1x8x64xf32>
    %101 = vector.broadcast %100 : vector<1x4x1x8x64xf32> to vector<1x4x2x8x64xf32>
    %102 = vector.shape_cast %101 : vector<1x4x2x8x64xf32> to vector<1x8x8x64xf32>
    %c2 = arith.constant 2 : index
    %103 = memref.load %arg2[%c2] : memref<3xf32, #tpu.memory_space<smem>>
    %104 = vector.broadcast %103 : f32 to vector<1x8x8x64xf32>
    %105 = arith.mulf %104, %102 : vector<1x8x8x64xf32>
    %106 = arith.addf %97, %105 : vector<1x8x8x64xf32>
    %c0_63 = arith.constant 0 : index
    %c0_64 = arith.constant 0 : index
    %c0_65 = arith.constant 0 : index
    %c0_66 = arith.constant 0 : index
    %107 = vector.load %arg9[%c0_63, %c0_64, %c0_65, %c0_66] : memref<1x8x8x64xf32, #tpu.memory_space<vmem>>, vector<1x8x8x64xf32>
    tpu.vector_store %arg9[%c0_63, %c0_64, %c0_65, %c0_66], %106 {strides = array<i32>} : memref<1x8x8x64xf32, #tpu.memory_space<vmem>>, vector<1x8x8x64xf32>,
    return
  }
  func.func @transform_0(%arg0: i32, %arg1: i32) -> i32 {
    %c0_i32 = arith.constant 0 : i32
    %c0_i32_0 = arith.constant 0 : i32
    return %c0_i32 : i32
  }
  func.func @transform_1(%arg0: i32, %arg1: i32) -> (i32, i32, i32, i32) {
    %c0_i32 = arith.constant 0 : i32
    %c0_i32_0 = arith.constant 0 : i32
    %c0_i32_1 = arith.constant 0 : i32
    return %arg0, %arg1, %c0_i32, %c0_i32_0 : i32, i32, i32, i32
  }
  func.func @transform_2(%arg0: i32, %arg1: i32) -> (i32, i32) {
    %c0_i32 = arith.constant 0 : i32
    %c0_i32_0 = arith.constant 0 : i32
    %c0_i32_1 = arith.constant 0 : i32
    return %c0_i32, %c0_i32_0 : i32, i32
  }
  func.func @transform_3(%arg0: i32, %arg1: i32) -> (i32, i32) {
    %c0_i32 = arith.constant 0 : i32
    %c0_i32_0 = arith.constant 0 : i32
    %c0_i32_1 = arith.constant 0 : i32
    return %c0_i32, %c0_i32_0 : i32, i32
  }
  func.func @transform_4(%arg0: i32, %arg1: i32) -> (i32, i32, i32, i32) {
    %c0_i32 = arith.constant 0 : i32
    %c0_i32_0 = arith.constant 0 : i32
    %c0_i32_1 = arith.constant 0 : i32
    return %arg0, %arg1, %c0_i32, %c0_i32_0 : i32, i32, i32, i32
  }
  func.func @transform_5(%arg0: i32, %arg1: i32) -> (i32, i32, i32, i32) {
    %c16_i32 = arith.constant 16 : i32
    %0 = arith.muli %c16_i32, %arg1 : i32
    %c1_i32 = arith.constant 1 : i32
    %1 = arith.subi %0, %c1_i32 : i32
    %c0_i32 = arith.constant 0 : i32
    %2 = arith.maxsi %1, %c0_i32 : i32
    %c0_i32_0 = arith.constant 0 : i32
    %c0_i32_1 = arith.constant 0 : i32
    %c0_i32_2 = arith.constant 0 : i32
    return %arg0, %2, %c0_i32_0, %c0_i32_1 : i32, i32, i32, i32
  }
  func.func @transform_6(%arg0: i32, %arg1: i32) -> (i32, i32, i32, i32) {
    %c0_i32 = arith.constant 0 : i32
    %c0_i32_0 = arith.constant 0 : i32
    %c0_i32_1 = arith.constant 0 : i32
    return %arg0, %arg1, %c0_i32, %c0_i32_0 : i32, i32, i32, i32
  }
  func.func @transform_7(%arg0: i32, %arg1: i32) -> (i32, i32, i32, i32) {
    %c0_i32 = arith.constant 0 : i32
    %c0_i32_0 = arith.constant 0 : i32
    %c0_i32_1 = arith.constant 0 : i32
    return %arg0, %arg1, %c0_i32, %c0_i32_0 : i32, i32, i32, i32
  }
}

</mosaic_0001>

<bundles_post_ra>
// kernel: tpu_custom_call.1
= control target key start
LH: loop header
LB: loop body
LE: loop exit
PB: predicated region body
PF: predicated region fallthrough
CT: control target
= control target key end

     0   :  { %s2745_s0 = inlined_call_operand.hbm [shape: f32[3], index: 0, kind: input, shape index: {}]   ;;  %s2746_s1 = inlined_call_operand.hbm [shape: f32[2,8,8,8], index: 1, kind: input, shape index: {}]   ;;  %s2747_s2 = inlined_call_operand.hbm [shape: f32[8,64], index: 2, kind: input, shape index: {}]   ;;  %s2748_s3 = inlined_call_operand.vmem [shape: f32[1,64], index: 3, kind: input, shape index: {}]   ;;  %s2749_s4 = inlined_call_operand.hbm [shape: f32[2,16,16,64], index: 4, kind: input, shape index: {}]   ;;  %s2750_s5 = inlined_call_operand.hbm [shape: f32[2,16,16,64], index: 5, kind: input, shape index: {}]   ;;  %s2751_s6 = inlined_call_operand.hbm [shape: f32[2,4,8,64], index: 6, kind: input, shape index: {}]   ;;  %s2752_s7 = inlined_call_operand.hbm [shape: f32[2,8,8,64], index: 7, kind: output, shape index: {}]  }
   0x1   :  { %2767 = sst [smem:[#allocation25_spill]] %s2746_s1 }
   0x2   :  { %2768 = sst [smem:[#allocation26_spill]] %s2749_s4 }
   0x3   :  { %2769 = sst [smem:[#allocation27_spill]] %s2750_s5 }
   0x4   :  { %12 = vsyncpa [#allocation6], 0 }
   0x5   :  { %13 = vsyncpa [#allocation4], 0 }
   0x6   :  { %15 = vsyncpa [#allocation4 + $0x1], 0 }
   0x7   :  { %16 = vsyncpa [#allocation9], 0 }
   0x8   :  { %17 = vsyncpa [#allocation5], 0 }
   0x9   :  { %19 = vsyncpa [#allocation5 + $0x1], 0  ;;  %s1874_s24 = smov 0   ;;  %s1876_s25 = smov 0  }
   0xa   :  { %s1878_s26 = smov 0   ;;  %s1880_s27 = smov 0  }
   0xb   :  { %s1882_s28 = smov 0   ;;  %s1884_s29 = smov 0  }
   0xc LB: > { %2770 = sst [smem:[#allocation19_spill]] %s1800_s26  ;;  %s37_s30 = sadd.s32 1, %s1808_s28  ;;  %s1812_s29 = sphi %s1884_s29, %s25_s29   ;;  %s1808_s28 = sphi %s1882_s28, %s2812_s28   ;;  %s1804_s27 = sphi %s1880_s27, %s2811_s27   ;;  %s1800_s26 = sphi %s1878_s26, %s2810_s26   ;;  %s1796_s25 = sphi %s1876_s25, %s2814_s25   ;;  %s1792_s24 = sphi %s1874_s24, %s2813_s24  }
   0xd   : > { %2771 = sst [smem:[#allocation20_spill]] %s1808_s28  ;;  %s67_s8 = sadd.s32 1, %s1800_s26 }
   0xe   : > { %2772 = sst [smem:[#allocation21_spill]] %s1812_s29  ;;  %p39_p0 = scmp.ge.s32.totalorder %s37_s30, 2 }
   0xf   : > { %p2753_p1 = scmp.ne.s32.totalorder %s1800_s26, %s1796_s25  ;;  %p75_p2 = scmp.eq.s32.totalorder %s1812_s29, 0 }
  0x10   : > { %s2816_s30 = smov (%p39_p0, %s37_s30), 0  ;;  %p1474_p5 = scmp.lt.s32.totalorder %s1812_s29, 2 }
  0x11   : > { %2773 = sst [smem:[#allocation22_spill]] %s2816_s30  ;;  %p76_p4 = por %p75_p2, %p2753_p1 }
  0x12   : > { %s62_s9 = ssub.s32 %s1808_s28, %s2816_s30  ;;  %s289_s10 = sand.u32 1, %s1812_s29  }
  0x13   : > { %p65_p6 = scmp.eq.s32.totalorder %s62_s9, 0  ;;  %s1920_s11 = sand.u32 1, %s1800_s26  }
  0x14   : > { %s1425_s12 = sshll.u32 %s1808_s28, 10  ;;  %s1397_s14 = sshll.u32 %s1920_s11, 6 }
  0x15   : > { %s1924_s13 = scalar_select %p65_p6, %s1800_s26, %s67_s8  }
  0x16   : > { %s2775_s1 = sld [smem:[#allocation25_spill]]  ;;  %p1932_p7 = pnand %p1474_p5, %p76_p4 }
  0x17   : > { %2774 = sst [smem:[#allocation23_spill]] %s1924_s13  ;;  %s293_s19 = scalar_lea.vmem [#allocation7], %s1397_s14 }
  0x18   : > { %s302_s20 = sshll.u32 %s293_s19, 4  ;;  %s1400_s21 = sshll.u32 %s1920_s11, 8  ;;  %s1936_s20 = int_to_ptr.vmem [resolvable:$true] %s302_s20 }
  0x19   : > { %s1939_s22 = scalar_lea.sflag [#allocation4], %s289_s10  ;;  %p1945_p9 = pneg %p1932_p7 }
  0x1c   : > { %s1930_s17 = scalar_lea.hbm %s2775_s1, %s1425_s12  ;;  %s1562_s14 = scalar_lea.hbm %s2775_s1, 2048 }
  0x1d   : > { %s1557_s23 = scalar_lea.hbm %s1930_s17, 1024  ;;  %p1563_p12 = scmp.lt.u32.totalorder %s1930_s17, %s2775_s1 }
  0x1e   : > { %p1558_p8 = scmp.ne.s32.totalorder %s1930_s17, %s1557_s23  ;;  %p1564_p13 = scmp.lt.u32.totalorder %s1562_s14, %s1557_s23 }
  0x1f   : > { %p1566_p2 = scmp.lt.u32.totalorder %s1557_s23, %s1930_s17 }
  0x20   : > { %p1560_p10 = pnand %p1945_p9, %p1558_p8  ;;  %p1565_p0 = por %p1564_p13, %p1563_p12 }
  0x22   : > { %p1561_p11 = pneg %p1560_p10  ;;  %p1567_p4 = por %p1566_p2, %p1565_p0 }
  0x24   : > { %p1568_p5 = pnand %p1567_p4, %p1561_p11 }
  0x26   : > { %1571 = shalt.err (!%p1568_p5)
}
  0x27   : > { %s1572_s10 = scalar_lea.vmem %s1936_s20, 1024  ;;  %s1814_s19 = smov [#allocation7]  }
  0x28   : > { %p1573_p6 = scmp.ne.s32.totalorder %s1936_s20, %s1572_s10  ;;  %s1577_s9 = sshll.u32 %s1814_s19, 4  ;;  %s1578_s9 = int_to_ptr.vmem [resolvable:$false] %s1577_s9 }
  0x29   : > { %s1579_s12 = scalar_lea.vmem %s1578_s9, 2048  ;;  %p1580_p3 = scmp.lt.s32.totalorder %s1936_s20, %s1578_s9 }
  0x2a   : > { %p1575_p8 = pnand %p1573_p6, %p1945_p9  ;;  %p1581_p1 = scmp.lt.s32.totalorder %s1579_s12, %s1572_s10 }
  0x2c   : > { %p1576_p10 = pneg %p1575_p8  ;;  %p1582_p12 = por %p1581_p1, %p1580_p3 }
  0x2e   : > { %p1583_p13 = pnand %p1582_p12, %p1576_p10 }
  0x30   : > { %1586 = shalt.err (!%p1583_p13)
}
  0x31   : > { %s2756_s23 = smov 128   ;;  %s2757_s14 = smov 8  }
  0x32   : > { %1458 = dma.hbm_to_vmem [thread:$0]  (!%p1932_p7), %s1930_s17, 1024, %s1936_s20, %s1939_s22, %s2756_s23, %s2756_s23, %s2757_s14  }
  0x33   : > { %s2755_s15 = sshll.u32 %s1808_s28, 12  ;;  %s2778_s4 = sld [smem:[#allocation26_spill]] }
  0x34   : > { %s316_s9 = scalar_lea.vmem [#allocation10], %s1400_s21  ;;  %s1403_s1 = sshll.u32 %s1920_s11, 4 }
  0x35   : > { %s326_s12 = sshll.u32 %s316_s9, 4  ;;  %s1982_s12 = int_to_ptr.vmem [resolvable:$true] %s326_s12 }
  0x39   : > { %s1978_s19 = scalar_lea.hbm %s2778_s4, %s2755_s15  ;;  %s1592_s16 = scalar_lea.hbm %s2778_s4, 8192 }
  0x3a   : > { %s1587_s30 = scalar_lea.hbm %s1978_s19, 4096  ;;  %p1593_p0 = scmp.lt.u32.totalorder %s1978_s19, %s2778_s4 }
  0x3b   : > { %p1588_p1 = scmp.ne.s32.totalorder %s1978_s19, %s1587_s30  ;;  %p1594_p2 = scmp.lt.u32.totalorder %s1592_s16, %s1587_s30 }
  0x3c   : > { %p1596_p5 = scmp.lt.u32.totalorder %s1587_s30, %s1978_s19 }
  0x3d   : > { %p1590_p3 = pnand %p1588_p1, %p1945_p9  ;;  %p1595_p4 = por %p1594_p2, %p1593_p0 }
  0x3f   : > { %p1591_p11 = pneg %p1590_p3  ;;  %p1597_p6 = por %p1596_p5, %p1595_p4 }
  0x41   : > { %p1598_p8 = pnand %p1597_p6, %p1591_p11 }
  0x43   : > { %1601 = shalt.err (!%p1598_p8)
}
  0x44   : > { %s1602_s21 = scalar_lea.vmem %s1982_s12, 4096  ;;  %s1817_s9 = smov [#allocation10]  }
  0x45   : > { %p1603_p10 = scmp.ne.s32.totalorder %s1982_s12, %s1602_s21  ;;  %s1607_s17 = sshll.u32 %s1817_s9, 4  ;;  %s1608_s17 = int_to_ptr.vmem [resolvable:$false] %s1607_s17 }
  0x46   : > { %s1609_s15 = scalar_lea.vmem %s1608_s17, 8192  ;;  %p1610_p1 = scmp.lt.s32.totalorder %s1982_s12, %s1608_s17 }
  0x47   : > { %p1605_p12 = pnand %p1603_p10, %p1945_p9  ;;  %p1611_p3 = scmp.lt.s32.totalorder %s1609_s15, %s1602_s21 }
  0x49   : > { %p1606_p13 = pneg %p1605_p12  ;;  %p1612_p0 = por %p1611_p3, %p1610_p1 }
  0x4b   : > { %p1613_p2 = pnand %p1612_p0, %p1606_p13 }
  0x4d   : > { %1616 = shalt.err (!%p1613_p2)
}
  0x4e   : > { %1461 = dma.hbm_to_vmem [thread:$0]  (!%p1932_p7), %s1978_s19, 4096, %s1982_s12, %s1939_s22, %s2756_s23, %s2756_s23, %s2757_s14  }
  0x4f   : > { %s2779_s30 = sshll.u32 %s1808_s28, 12  ;;  %s2780_s5 = sld [smem:[#allocation27_spill]] }
  0x50   : > { %s340_s21 = scalar_lea.vmem [#allocation11], %s1403_s1 }
  0x51   : > { %s353_s9 = sshll.u32 %s340_s21, 4  ;;  %s2019_s9 = int_to_ptr.vmem [resolvable:$true] %s353_s9 }
  0x55   : > { %s2015_s10 = scalar_lea.hbm %s2780_s5, %s2779_s30  ;;  %s1622_s15 = scalar_lea.hbm %s2780_s5, 8192 }
  0x56   : > { %s1617_s17 = scalar_lea.hbm %s2015_s10, 256  ;;  %p1623_p6 = scmp.lt.u32.totalorder %s2015_s10, %s2780_s5 }
  0x57   : > { %p1618_p11 = scmp.ne.s32.totalorder %s2015_s10, %s1617_s17  ;;  %p1624_p8 = scmp.lt.u32.totalorder %s1622_s15, %s1617_s17 }
  0x58   : > { %p1626_p12 = scmp.lt.u32.totalorder %s1617_s17, %s2015_s10 }
  0x59   : > { %p1620_p4 = pnand %p1618_p11, %p1945_p9  ;;  %p1625_p10 = por %p1624_p8, %p1623_p6 }
  0x5b   : > { %p1621_p5 = pneg %p1620_p4  ;;  %p1627_p13 = por %p1626_p12, %p1625_p10 }
  0x5d   : > { %p1628_p1 = pnand %p1627_p13, %p1621_p5 }
  0x5f   : > { %1631 = shalt.err (!%p1628_p1)
}
  0x60   : > { %s1632_s1 = scalar_lea.vmem %s2019_s9, 256  ;;  %s1818_s16 = smov [#allocation11]  }
  0x61   : > { %p1633_p3 = scmp.ne.s32.totalorder %s2019_s9, %s1632_s1  ;;  %s1637_s21 = sshll.u32 %s1818_s16, 4  ;;  %s1638_s21 = int_to_ptr.vmem [resolvable:$false] %s1637_s21 }
  0x62   : > { %s1639_s19 = scalar_lea.vmem %s1638_s21, 512  ;;  %p1640_p11 = scmp.lt.s32.totalorder %s2019_s9, %s1638_s21 }
  0x63   : > { %p1635_p0 = pnand %p1633_p3, %p1945_p9  ;;  %p1641_p4 = scmp.lt.s32.totalorder %s1639_s19, %s1632_s1 }
  0x65   : > { %p1636_p2 = pneg %p1635_p0  ;;  %p1642_p6 = por %p1641_p4, %p1640_p11 }
  0x67   : > { %p1643_p8 = pnand %p1642_p6, %p1636_p2 }
  0x69   : > { %1646 = shalt.err (!%p1643_p8)
}
  0x6a   : > { %1464 = dma.hbm_to_vmem [thread:$0]  (!%p1932_p7), %s2015_s10, 256, %s2019_s9, %s1939_s22, %s2756_s23, %s2756_s23, %s2757_s14  }
  0x6b   : > { %s2047_s17 = sadd.s32 4294967295, %s1812_s29   ;;  %s1392_s12 = sadd.s32 4294967294, %s1812_s29  }
  0x6c   : > { %p80_p5 = scmp.ne.s32.totalorder %s1796_s25, %s1792_s24  ;;  %p2762_p10 = scmp.eq.s32.totalorder %s2047_s17, 0 }
  0x6d   : > { %p240_p12 = scmp.eq.s32.totalorder %s2047_s17, 1  ;;  %p246_p13 = scmp.eq.s32.totalorder %s1392_s12, 1 }
  0x6e   : > { %p2056_p1 = por %p2762_p10, %p80_p5  ;;  %p1393_p3 = scmp.ge.s32.totalorder %s1812_s29, 1 }
  0x6f   : > { %p2782_p0 = scmp.ne.s32.totalorder %s1800_s26, %s1796_s25  ;;  %p2068_p11 = por %p246_p13, %p80_p5 }
  0x70   : > { %s2781_s15 = scalar_select %p2056_p1, 1, 0 }
  0x71   : > { %p2064_p2 = por %p240_p12, %p2782_p0  ;;  %p253_p4 = scmp.lt.s32.totalorder %s1812_s29, 3 }
  0x72   : > { %s2784_s9 = scalar_select %p2068_p11, 1, 0 }
  0x73   : > { %s2783_s10 = scalar_select %p2064_p2, 1, 0 }
  0x74   : > { %p2073_p6 = pnand %p1393_p3, %p253_p4  ;;  %s1819_s20 = smov [#allocation8]  }
  0x75   : > { %s275_s1 = sshll.u32 %s1819_s20, 4  ;;  %s1406_s16 = sshll.u32 %s1920_s11, 5  ;;  %s2087_s1 = int_to_ptr.vmem [resolvable:$true] %s275_s1 }
  0x76   : > { %s2785_s30 = scalar_select %p2073_p6, 1, 0 }
  0x77   : > { %p1448_p8 = pneg %p2073_p6  ;;  %s1428_s21 = sshll.u32 %s1808_s28, 9 }
  0x78   : > { %s367_s19 = scalar_lea.vmem [#allocation12], %s1406_s16  ;;  %s2092_s5 = scalar_lea.hbm %s2751_s6, %s1428_s21 }
  0x79   : > { %s376_s12 = sshll.u32 %s367_s19, 4  ;;  %p2083_p12 = pnand %p1448_p8, %p2762_p10  ;;  %s2094_s12 = int_to_ptr.vmem [resolvable:$true] %s376_s12 }
  0x7a   : > { %s1647_s16 = scalar_lea.hbm %s2745_s0, 16 }
  0x7b   : > { %p1648_p5 = scmp.ne.s32.totalorder %s2745_s0, %s1647_s16  ;;  %p1649_p13 = pneg %p2083_p12 }
  0x7c   : > { %p1654_p4 = scmp.lt.u32.totalorder %s1647_s16, %s2745_s0 }
  0x7d   : > { %p1650_p3 = pnand %p1649_p13, %p1648_p5 }
  0x7f   : > { %p1651_p0 = pneg %p1650_p3 }
  0x81   : > { %p1656_p8 = pnand %p1654_p4, %p1651_p0 }
  0x83   : > { %1659 = shalt.err (!%p1656_p8)
}
  0x84   : > { %s1820_s14 = smov [#allocation3]   ;;  %s1660_s19 = scalar_lea.hbm %s2747_s2, 128 }
  0x85   : > { %1451 = dma.hbm_to_smem (!%p2083_p12), %s2745_s0, 16, %s1820_s14, [#allocation6]  }
  0x86   : > { %p1661_p5 = scmp.ne.s32.totalorder %s2747_s2, %s1660_s19  ;;  %p1667_p4 = scmp.lt.u32.totalorder %s1660_s19, %s2747_s2 }
  0x88   : > { %p1663_p3 = pnand %p1661_p5, %p1649_p13 }
  0x8a   : > { %p1664_p0 = pneg %p1663_p3 }
  0x8c   : > { %p1669_p8 = pnand %p1667_p4, %p1664_p0 }
  0x8e   : > { %1672 = shalt.err (!%p1669_p8)
}
  0x8f   : > { %s1673_s4 = scalar_lea.vmem %s2087_s1, 128  ;;  %p1681_p1 = scmp.lt.s32.totalorder %s2087_s1, %s2087_s1 }
  0x90   : > { %p1674_p10 = scmp.ne.s32.totalorder %s2087_s1, %s1673_s4  ;;  %p1682_p5 = scmp.lt.s32.totalorder %s1673_s4, %s1673_s4 }
  0x92   : > { %p1676_p11 = pnand %p1674_p10, %p1649_p13  ;;  %p1683_p3 = por %p1682_p5, %p1681_p1 }
  0x94   : > { %p1677_p2 = pneg %p1676_p11 }
  0x96   : > { %p1684_p6 = pnand %p1683_p3, %p1677_p2 }
  0x98   : > { %1687 = shalt.err (!%p1684_p6)
}
  0x99   : > { %1454 = dma.hbm_to_vmem [thread:$0]  (!%p2083_p12), %s2747_s2, 128, %s2087_s1, [#allocation9]  }
  0x9a   : > { %s1688_s14 = scalar_lea.hbm %s2092_s5, 512  ;;  %s1693_s28 = scalar_lea.hbm %s2751_s6, 1024 }
  0x9b   : > { %p1689_p10 = scmp.ne.s32.totalorder %s2092_s5, %s1688_s14  ;;  %p1694_p1 = scmp.lt.u32.totalorder %s2092_s5, %s2751_s6 }
  0x9c   : > { %p1695_p2 = scmp.lt.u32.totalorder %s1693_s28, %s1688_s14  ;;  %p1697_p0 = scmp.lt.u32.totalorder %s1688_s14, %s2092_s5 }
  0x9d   : > { %p1691_p11 = pnand %p1689_p10, %p1945_p9 }
  0x9e   : > { %p1696_p6 = por %p1695_p2, %p1694_p1 }
  0x9f   : > { %p1692_p13 = pneg %p1691_p11 }
  0xa0   : > { %p1698_p4 = por %p1697_p0, %p1696_p6 }
  0xa2   : > { %p1699_p8 = pnand %p1698_p4, %p1692_p13 }
  0xa4   : > { %1702 = shalt.err (!%p1699_p8)
}
  0xa5   : > { %s1703_s1 = scalar_lea.vmem %s2094_s12, 512  ;;  %s1821_s19 = smov [#allocation12]  }
  0xa6   : > { %p1704_p12 = scmp.ne.s32.totalorder %s2094_s12, %s1703_s1  ;;  %s1708_s13 = sshll.u32 %s1821_s19, 4  ;;  %s1709_s13 = int_to_ptr.vmem [resolvable:$false] %s1708_s13 }
  0xa7   : > { %s1710_s16 = scalar_lea.vmem %s1709_s13, 1024  ;;  %p1711_p10 = scmp.lt.s32.totalorder %s2094_s12, %s1709_s13 }
  0xa8   : > { %p1706_p5 = pnand %p1704_p12, %p1945_p9  ;;  %p1712_p11 = scmp.lt.s32.totalorder %s1710_s16, %s1703_s1 }
  0xaa   : > { %p1707_p3 = pneg %p1706_p5  ;;  %p1713_p1 = por %p1712_p11, %p1711_p10 }
  0xac   : > { %p1714_p2 = pnand %p1713_p1, %p1707_p3 }
  0xae   : > { %1717 = shalt.err (!%p1714_p2)
}
  0xaf   : > { %s2787_s4 = smov 8   ;;  %s2788_s26 = smov 128  }
  0xb0   : > { %1467 = dma.hbm_to_vmem [thread:$0]  (!%p1932_p7), %s2092_s5, 512, %s2094_s12, %s1939_s22, %s2788_s26, %s2788_s26, %s2787_s4  }
  0xb1   : > { %p2789_p9 = scmp.ne.s32.totalorder %s2785_s30, 0 }
  0xb3   : > { %388 = sbr.rel (%p2789_p9) target bundleno = 503 (0x1f7), region = 48 }
  0xba   : > { %p2790_p13 = scmp.eq.s32.totalorder %s2047_s17, 0 }
  0xbc   : > { %1771 = dma.done.wait (%p2790_p13), [#allocation6], 16   ;;  %p2791_p6 = pmov %p2790_p13 }
  0xbd   : > { %s394_s18 = sand.u32 1, %s2047_s17   ;;  %s2173_s8 = sand.u32 1, %s1796_s25  }
  0xbe   : > { %1773 = vsyncadd (%p2791_p6), [#allocation6], 4294967280  ;;  %s1411_s29 = sshll.u32 %s2173_s8, 6  ;;  %s395_s14 = scalar_lea.sflag [#allocation4], %s394_s18 }
  0xbf   : > { %s398_s5 = scalar_lea.vmem [#allocation7], %s1411_s29  ;;  %p2792_p7 = scmp.ne.s32.totalorder %s2781_s15, 0 }
  0xc1   : > { %1775 = dma.done.wait (%p2792_p7), %s395_s14, 1024  }
  0xc2   : > { %1777 = vsyncadd (%p2792_p7), %s395_s14, 4294966272  ;;  %p2793_p0 = pmov %p2791_p6 }
  0xc4   : > { %1779 = dma.done.wait (%p2793_p0), [#allocation9], 128   ;;  %p2794_p4 = pmov %p2793_p0 }
  0xc5   : > { %s1413_s22 = sshll.u32 %s2173_s8, 8 }
  0xc6   : > { %1781 = vsyncadd (%p2794_p4), [#allocation9], 4294967168  ;;  %s2187_s30 = scalar_lea.vmem [#allocation10], %s1413_s22 }
  0xc7   : > { %1783 = dma.done.wait (%p2792_p7), %s395_s14, 4864  }
  0xc8   : > { %1785 = vsyncadd (%p2792_p7), %s395_s14, 4294962432  ;;  %s1414_s12 = sshll.u32 %s2173_s8, 4  ;;  %s1415_s21 = sshll.u32 %s2173_s8, 5 }
  0xc9   : > { %s2195_s11 = scalar_lea.vmem [#allocation11], %s1414_s12  ;;  %s2197_s28 = scalar_lea.vmem [#allocation12], %s1415_s21 }
  0xca   : > { %434 = sfence }
  0xcb   : > { %v2199_v0 = vld [vmem:[%s398_s5 + $0x10] sm:$0xff]  ;;  %v2201_v1 = vld [vmem:[%s398_s5] sm:$0xff]  ;;  %v1822_v2 = vmov 0   ;;  %v2205_v3 = vld [vmem:[%s398_s5 + $0x18] sm:$0xff]  ;;  %v1823_v9 = vmov 1   ;;  %v1824_v10 = vmov 2  }
  0xcc   : > { %1542 = vset.pattern.permute.xlu1 %v1822_v2  ;;  %1541 = vset.pattern.permute.xlu0 %v1822_v2  ;;  %v2207_v4 = vld [vmem:[%s398_s5 + $0x8] sm:$0xff]  ;;  %v2213_v6 = vld [vmem:[%s398_s5 + $0x20] sm:$0xff]  ;;  %v2217_v7 = vld [vmem:[%s398_s5 + $0x38] sm:$0xff]  ;;  %v1825_v11 = vmov 3   ;;  %v1826_v12 = vmov 4   ;;  %v1827_v13 = vmov 5  }
  0xcd   : > { %506 = vperm.xlu1 %1542, %v2199_v0   ;;  %496 = vperm.xlu0 %1541, %v2201_v1   ;;  %v2211_v5 = vld [vmem:[%s398_s5 + $0x28] sm:$0xff]  ;;  %v2219_v8 = vld [vmem:[%s398_s5 + $0x30] sm:$0xff]  ;;  %vm984_vm0 = vcmask 523264   ;;  %v1828_v16 = vmov -inf   ;;  %v1829_v17 = vmov 6   ;;  %v2272_v23 = vld [vmem:[%s2187_s30 + $0x50] sm:$0xff] }
  0xce   : > { %v982_v14 = vld [vmem:[%s2195_s11] sm:$0xff]  ;;  %v983_v15 = vld [vmem:[%s2195_s11 + $0x8] sm:$0xff]  ;;  %998 = vst.msk [vmem:[#allocation2 + $0x30] sm:$0xff] %vm984_vm0, %v2272_v23  ;;  %v1830_v42 = vmov 7   ;;  %vm1119_vm1 = vcmask 516096   ;;  %vm1128_vm2 = vcmask 522240  }
  0xcf   : > { %985 = vst.msk [vmem:[#allocation2] sm:$0xff] %vm984_vm0, %v982_v14  ;;  %986 = vst.msk [vmem:[#allocation2 + $0x8] sm:$0xff] %vm984_vm0, %v983_v15  ;;  %v950_v18 = vld [vmem:[%s2187_s30] sm:$0xff]  ;;  %v951_v19 = vld [vmem:[%s2187_s30 + $0x8] sm:$0xff]  ;;  %s1418_s17 = sld [smem:[#allocation3 + $0x1]]  ;;  %s1419_s15 = sld [smem:[#allocation3 + $0x2]] }
  0xd0   : > { %991 = vst.msk [vmem:[#allocation2] sm:$0xff] %vm984_vm0, %v1828_v16  ;;  %992 = vst.msk [vmem:[#allocation2 + $0x8] sm:$0xff] %vm984_vm0, %v1828_v16  ;;  %v2275_v24 = vld [vmem:[%s2187_s30 + $0x58] sm:$0xff]  ;;  %v952_v25 = vld [vmem:[%s2187_s30 + $0x10] sm:$0xff]  ;;  %s932_s23 = sld [smem:[#allocation3]]  ;;  %s2587_s19 = scalar_lea.vmem [#allocation13], %s1411_s29 }
  0xd1   : > { %511 = vperm.xlu1 %1542, %v2205_v3   ;;  %501 = vperm.xlu0 %1541, %v2207_v4   ;;  %v953_v26 = vld [vmem:[%s2187_s30 + $0x18] sm:$0xff]  ;;  %999 = vst.msk [vmem:[#allocation2 + $0x38] sm:$0xff] %vm984_vm0, %v2275_v24  ;;  %994 = vst.msk [vmem:[#allocation2 + $0x10] sm:$0xff] %vm984_vm0, %v952_v25  ;;  %v2288_v30 = vld [vmem:[%s2187_s30 + $0x90] sm:$0xff]  ;;  %s1429_s13 = sshll.u32 %s1804_s27, 10  ;;  %s1213_s16 = sshll.u32 %s2587_s19, 4  ;;  %s2693_s16 = int_to_ptr.vmem [resolvable:$true] %s1213_s16 }
  0xd2   : > { %995 = vst.msk [vmem:[#allocation2 + $0x18] sm:$0xff] %vm984_vm0, %v953_v26  ;;  %v2291_v31 = vld [vmem:[%s2187_s30 + $0x98] sm:$0xff]  ;;  %1002 = vst.msk [vmem:[#allocation2 + $0x50] sm:$0xff] %vm984_vm0, %v2288_v30  ;;  %v962_v32 = vld [vmem:[%s2187_s30 + $0x60] sm:$0xff]  ;;  %s2691_s18 = scalar_lea.hbm %s2752_s7, %s1429_s13  ;;  %s1198_s29 = scalar_lea.sflag [#allocation5], %s2173_s8 }
  0xd3   : > { %1003 = vst.msk [vmem:[#allocation2 + $0x58] sm:$0xff] %vm984_vm0, %v2291_v31  ;;  %v963_v33 = vld [vmem:[%s2187_s30 + $0x68] sm:$0xff]  ;;  %v2304_v34 = vld [vmem:[%s2187_s30 + $0xd0] sm:$0xff]  ;;  %v2307_v37 = vld [vmem:[%s2187_s30 + $0xd8] sm:$0xff]  ;;  %s1718_s27 = scalar_lea.vmem %s2693_s16, 1024  ;;  %p2805_p12 = scmp.ne.s32.totalorder %s2783_s10, 0 }
  0xd4   : > { %1006 = vst.msk [vmem:[#allocation2 + $0x70] sm:$0xff] %vm984_vm0, %v2304_v34  ;;  %v964_v38 = vld [vmem:[%s2187_s30 + $0x70] sm:$0xff]  ;;  %v965_v39 = vld [vmem:[%s2187_s30 + $0x78] sm:$0xff]  ;;  %1007 = vst.msk [vmem:[#allocation2 + $0x78] sm:$0xff] %vm984_vm0, %v2307_v37  ;;  %p1719_p8 = scmp.ne.s32.totalorder %s2693_s16, %s1718_s27  ;;  %s1831_s14 = smov [#allocation13]  }
  0xd5   : > { %521 = vperm.xlu1 %1542, %v2211_v5   ;;  %516 = vperm.xlu0 %1541, %v2213_v6   ;;  %v1014_v35 = vld [vmem:[#allocation2 + $0x30] sm:$0xff]  ;;  %1000 = vst.msk [vmem:[#allocation2 + $0x40] sm:$0xff] %vm984_vm0, %v964_v38  ;;  %1001 = vst.msk [vmem:[#allocation2 + $0x48] sm:$0xff] %vm984_vm0, %v965_v39  ;;  %v970_v45 = vld [vmem:[%s2187_s30 + $0xa0] sm:$0xff]  ;;  %s1722_s5 = sshll.u32 %s1831_s14, 4  ;;  %s1723_s5 = int_to_ptr.vmem [resolvable:$false] %s1722_s5 }
  0xd6   : > { %v1030_v40 = vmax.f32 %v1014_v35, %v962_v32  ;;  %v971_v46 = vld [vmem:[%s2187_s30 + $0xa8] sm:$0xff]  ;;  %v972_v53 = vld [vmem:[%s2187_s30 + $0xb0] sm:$0xff]  ;;  %v973_v54 = vld [vmem:[%s2187_s30 + $0xb8] sm:$0xff]  ;;  %p1720_p5 = pnand %p1719_p8, %p2805_p12  ;;  %s1724_s22 = scalar_lea.vmem %s1723_s5, 2048 }
  0xd7   : > { %v1008_v20 = vld [vmem:[#allocation2] sm:$0xff]  ;;  %v1009_v21 = vld [vmem:[#allocation2 + $0x8] sm:$0xff]  ;;  %1004 = vst.msk [vmem:[#allocation2 + $0x60] sm:$0xff] %vm984_vm0, %v972_v53  ;;  %1005 = vst.msk [vmem:[#allocation2 + $0x68] sm:$0xff] %vm984_vm0, %v973_v54  ;;  %p1725_p10 = scmp.lt.s32.totalorder %s2693_s16, %s1723_s5  ;;  %p1726_p11 = scmp.lt.s32.totalorder %s1724_s22, %s1718_s27 }
  0xd8   : > { %v1024_v22 = vmax.f32 %v1008_v20, %v950_v18  ;;  %v1025_v27 = vmax.f32 %v1009_v21, %v951_v19  ;;  %v1015_v36 = vld [vmem:[#allocation2 + $0x38] sm:$0xff]  ;;  %v1046_v43 = vmax.f32 %v1030_v40, %v964_v38  ;;  %v957_v58 = vld [vmem:[%s2187_s30 + $0x38] sm:$0xff]  ;;  %v978_v60 = vld [vmem:[%s2187_s30 + $0xe0] sm:$0xff]  ;;  %p1721_p3 = pneg %p1720_p5 }
  0xd9   : > { %531 = vperm.xlu1 %1542, %v2217_v7   ;;  %526 = vperm.xlu0 %1541, %v2219_v8   ;;  %v1031_v41 = vmax.f32 %v1015_v36, %v963_v33  ;;  %v1018_v47 = vld [vmem:[#allocation2 + $0x50] sm:$0xff]  ;;  %v956_v57 = vld [vmem:[%s2187_s30 + $0x30] sm:$0xff]  ;;  %997 = vst.msk [vmem:[#allocation2 + $0x28] sm:$0xff] %vm984_vm0, %v957_v58  ;;  %p1727_p1 = por %p1726_p11, %p1725_p10 }
  0xda   : > { %v1040_v28 = vmax.f32 %v1024_v22, %v952_v25  ;;  %v1041_v29 = vmax.f32 %v1025_v27, %v953_v26  ;;  %v1019_v50 = vld [vmem:[#allocation2 + $0x58] sm:$0xff]  ;;  %v1034_v51 = vmax.f32 %v1018_v47, %v970_v45  ;;  %1062 = vst.msk [vmem:[#allocation2 + $0x30] sm:$0xff] %vm984_vm0, %v1046_v43  ;;  %996 = vst.msk [vmem:[#allocation2 + $0x20] sm:$0xff] %vm984_vm0, %v956_v57  ;;  %v979_v62 = vld [vmem:[%s2187_s30 + $0xe8] sm:$0xff] }
  0xdb   : > { %v1047_v44 = vmax.f32 %v1031_v41, %v965_v39  ;;  %v1035_v55 = vmax.f32 %v1019_v50, %v971_v46  ;;  %v980_v63 = vld [vmem:[%s2187_s30 + $0xf0] sm:$0xff]  ;;  %v1022_v2 = vld [vmem:[#allocation2 + $0x70] sm:$0xff]  ;;  %p1728_p2 = pnand %p1727_p1, %p1721_p3 }
  0xdc   : > { %1056 = vst.msk [vmem:[#allocation2] sm:$0xff] %vm984_vm0, %v1040_v28  ;;  %1057 = vst.msk [vmem:[#allocation2 + $0x8] sm:$0xff] %vm984_vm0, %v1041_v29  ;;  %v1050_v56 = vmax.f32 %v1034_v51, %v972_v53  ;;  %v1010_v14 = vld [vmem:[#allocation2 + $0x10] sm:$0xff]  ;;  %v1011_v15 = vld [vmem:[#allocation2 + $0x18] sm:$0xff] }
  0xdd   : > { %1544 = vset.pattern.permute.xlu1 %v1823_v9  ;;  %1543 = vset.pattern.permute.xlu0 %v1823_v9  ;;  %1063 = vst.msk [vmem:[#allocation2 + $0x38] sm:$0xff] %vm984_vm0, %v1047_v44  ;;  %v1051_v59 = vmax.f32 %v1035_v55, %v973_v54  ;;  %v1023_v9 = vld [vmem:[#allocation2 + $0x78] sm:$0xff]  ;;  %v958_v28 = vld [vmem:[%s2187_s30 + $0x40] sm:$0xff]  ;;  %v959_v29 = vld [vmem:[%s2187_s30 + $0x48] sm:$0xff] }
  0xde   : > { %559 = vperm.xlu1 %1544, %v2207_v4   ;;  %555 = vperm.xlu0 %1543, %v2201_v1   ;;  %1066 = vst.msk [vmem:[#allocation2 + $0x50] sm:$0xff] %vm984_vm0, %v1050_v56  ;;  %v966_v44 = vld [vmem:[%s2187_s30 + $0x80] sm:$0xff]  ;;  %v967_v45 = vld [vmem:[%s2187_s30 + $0x88] sm:$0xff]  ;;  %v1016_v46 = vld [vmem:[#allocation2 + $0x40] sm:$0xff] }
  0xdf   : > { %1067 = vst.msk [vmem:[#allocation2 + $0x58] sm:$0xff] %vm984_vm0, %v1051_v59  ;;  %v1017_v47 = vld [vmem:[#allocation2 + $0x48] sm:$0xff]  ;;  %v1032_v50 = vmax.f32 %v1016_v46, %v966_v44 }
  0xe0   : > { %v1013_v33 = vld [vmem:[#allocation2 + $0x28] sm:$0xff] }
  0xe1   : > { %v1012_v32 = vld [vmem:[#allocation2 + $0x20] sm:$0xff]  ;;  %v1029_v38 = vmax.f32 %v1013_v33, %v959_v29  ;;  %v974_v54 = vld [vmem:[%s2187_s30 + $0xc0] sm:$0xff] }
  0xe2   : > { %563 = vperm.xlu1 %1544, %v2199_v0   ;;  %567 = vperm.xlu0 %1543, %v2205_v3   ;;  %v1028_v35 = vmax.f32 %v1012_v32, %v958_v28 }
  0xe3   : > { %v2322_v48 = vld [vmem:[#allocation2] ss:$2 sm:$0xff]  ;;  %v2324_v49 = vld [vmem:[#allocation2 + $0x1] ss:$2 sm:$0xff]  ;;  %v1045_v43 = vmax.f32 %v1029_v38, %v2275_v24 }
  0xe4   : > { %v1111_v52 = vld [vmem:[#allocation2 + $0x1] ss:$2 sm:$0x7f]  ;;  %1120 = vst.msk [vmem:[#allocation2] sm:$0x1] %vm1119_vm1, %v1828_v16  ;;  %v1044_v40 = vmax.f32 %v1028_v35, %v2272_v23  ;;  %v1033_v23 = vmax.f32 %v1017_v47, %v967_v45 }
  0xe5   : > { %1129 = vst.msk [vmem:[#allocation2 + $0x1] sm:$0x7f] %vm1128_vm2, %v1111_v52  ;;  %v2355_v18 = vld [vmem:[#allocation2 + $0x31] ss:$2 sm:$0xff] }
  0xe6   : > { %571 = vperm.xlu1 %1544, %v2213_v6   ;;  %575 = vperm.xlu0 %1543, %v2211_v5   ;;  %v1114_v22 = vld [vmem:[#allocation2 + $0x31] ss:$2 sm:$0x7f]  ;;  %v2366_v36 = vld [vmem:[#allocation2 + $0x50] ss:$2 sm:$0xff]  ;;  %1060 = vst.msk [vmem:[#allocation2 + $0x20] sm:$0xff] %vm984_vm0, %v1044_v40  ;;  %v1049_v53 = vmax.f32 %v1033_v23, %v2291_v31 }
  0xe7   : > { %v1116_v39 = vld [vmem:[#allocation2 + $0x51] ss:$2 sm:$0x7f]  ;;  %1125 = vst.msk [vmem:[#allocation2 + $0x50] sm:$0x1] %vm1119_vm1, %v1828_v16  ;;  %v1020_v31 = vld [vmem:[#allocation2 + $0x60] sm:$0xff] }
  0xe8   : > { %1061 = vst.msk [vmem:[#allocation2 + $0x28] sm:$0xff] %vm984_vm0, %v1045_v43  ;;  %1065 = vst.msk [vmem:[#allocation2 + $0x48] sm:$0xff] %vm984_vm0, %v1049_v53 }
  0xea   : > { %579 = vperm.xlu1 %1544, %v2219_v8   ;;  %583 = vperm.xlu0 %1543, %v2217_v7  }
  0xec   : > { %v1137_v51 = vld [vmem:[#allocation2] sm:$0xff] }
  0xee   : > { %1545 = vset.pattern.permute.xlu1 %v1824_v10  ;;  %1546 = vset.pattern.permute.xlu0 %v1824_v10  ;;  %v1038_v10 = vmax.f32 %v1022_v2, %v978_v60  ;;  %v534_v60 = vlaneseq }
  0xef   : > { %607 = vperm.xlu1 %1545, %v2201_v1   ;;  %611 = vperm.xlu0 %1546, %v2207_v4  }
  0xf0   : > { %v1054_v19 = vmax.f32 %v1038_v10, %v980_v63  ;;  %v1036_v63 = vmax.f32 %v1020_v31, %v974_v54 }
  0xf2   : > { %1070 = vst.msk [vmem:[#allocation2 + $0x70] sm:$0xff] %vm984_vm0, %v1054_v19 }
  0xf3   : > { %615 = vperm.xlu1 %1545, %v2199_v0   ;;  %623 = vperm.xlu0 %1546, %v2213_v6  }
  0xf7   : > { %619 = vperm.xlu1 %1545, %v2205_v3   ;;  %631 = vperm.xlu0 %1546, %v2219_v8  }
  0xfb   : > { %627 = vperm.xlu1 %1545, %v2211_v5   ;;  %1547 = vset.pattern.permute.xlu0 %v1825_v11 }
  0xfc   : > { %659 = vperm.xlu0 %1547, %v2201_v1  }
  0xff   : > { %635 = vperm.xlu1 %1545, %v2217_v7  }
 0x100   : > { %671 = vperm.xlu0 %1547, %v2205_v3  }
 0x103   : > { %1548 = vset.pattern.permute.xlu1 %v1825_v11  ;;  %v954_v11 = vld [vmem:[%s2187_s30 + $0x20] sm:$0xff] }
 0x104   : > { %663 = vperm.xlu1 %1548, %v2207_v4   ;;  %679 = vperm.xlu0 %1547, %v2211_v5   ;;  %v1026_v20 = vmax.f32 %v1010_v14, %v954_v11  ;;  %v2413_v11 = vld [vmem:[#allocation2 + $0x20] ss:$2 sm:$0xff]  ;;  %v1113_v14 = vld [vmem:[#allocation2 + $0x21] ss:$2 sm:$0x7f] }
 0x105   : > { %1122 = vst.msk [vmem:[#allocation2 + $0x20] sm:$0x1] %vm1119_vm1, %v1828_v16 }
 0x106   : > { %v1042_v26 = vmax.f32 %v1026_v20, %v956_v57 }
 0x108   : > { %667 = vperm.xlu1 %1548, %v2199_v0   ;;  %687 = vperm.xlu0 %1547, %v2217_v7   ;;  %1058 = vst.msk [vmem:[#allocation2 + $0x10] sm:$0xff] %vm984_vm0, %v1042_v26 }
 0x10c   : > { %675 = vperm.xlu1 %1548, %v2213_v6   ;;  %1550 = vset.pattern.permute.xlu0 %v1826_v12 }
 0x10d   : > { %715 = vperm.xlu0 %1550, %v2207_v4  }
 0x110   : > { %683 = vperm.xlu1 %1548, %v2219_v8  }
 0x111   : > { %727 = vperm.xlu0 %1550, %v2213_v6  }
 0x114   : > { %1549 = vset.pattern.permute.xlu1 %v1826_v12  ;;  %v955_v12 = vld [vmem:[%s2187_s30 + $0x28] sm:$0xff] }
 0x115   : > { %711 = vperm.xlu1 %1549, %v2201_v1   ;;  %735 = vperm.xlu0 %1550, %v2219_v8   ;;  %v1027_v21 = vmax.f32 %v1011_v15, %v955_v12  ;;  %v2415_v12 = vld [vmem:[#allocation2 + $0x21] ss:$2 sm:$0xff]  ;;  %v2420_v15 = vshrl.u32 %v534_v60, 7 }
 0x116   : > { %1131 = vst.msk [vmem:[#allocation2 + $0x21] sm:$0x7f] %vm1128_vm2, %v1113_v14 }
 0x117   : > { %v1043_v27 = vmax.f32 %v1027_v21, %v957_v58  ;;  %v848_v47 = vsub.s32 6, %v2420_v15 }
 0x119   : > { %719 = vperm.xlu1 %1549, %v2199_v0   ;;  %1551 = vset.pattern.permute.xlu0 %v1827_v13  ;;  %1059 = vst.msk [vmem:[#allocation2 + $0x18] sm:$0xff] %vm984_vm0, %v1043_v27 }
 0x11a   : > { %763 = vperm.xlu0 %1551, %v2201_v1  }
 0x11d   : > { %723 = vperm.xlu1 %1549, %v2205_v3  }
 0x11e   : > { %775 = vperm.xlu0 %1551, %v2205_v3  }
 0x120   : > { %v2403_v58 = vld [vmem:[#allocation2 + $0x11] ss:$2 sm:$0xff] }
 0x121   : > { %731 = vperm.xlu1 %1549, %v2211_v5   ;;  %v1112_v59 = vld [vmem:[#allocation2 + $0x11] ss:$2 sm:$0x7f] }
 0x122   : > { %783 = vperm.xlu0 %1551, %v2211_v5  }
 0x125   : > { %739 = vperm.xlu1 %1549, %v2217_v7  }
 0x126   : > { %791 = vperm.xlu0 %1551, %v2217_v7  }
 0x129   : > { %1552 = vset.pattern.permute.xlu1 %v1827_v13  ;;  %v1039_v13 = vmax.f32 %v1023_v9, %v979_v62  ;;  %v1021_v62 = vld [vmem:[#allocation2 + $0x68] sm:$0xff] }
 0x12a   : > { %767 = vperm.xlu1 %1552, %v2207_v4   ;;  %1554 = vset.pattern.permute.xlu0 %v1829_v17 }
 0x12b   : > { %819 = vperm.xlu0 %1554, %v2207_v4  }
 0x12e   : > { %771 = vperm.xlu1 %1552, %v2199_v0  }
 0x12f   : > { %831 = vperm.xlu0 %1554, %v2213_v6  }
 0x132   : > { %779 = vperm.xlu1 %1552, %v2213_v6  }
 0x133   : > { %839 = vperm.xlu0 %1554, %v2219_v8  }
 0x136   : > { %787 = vperm.xlu1 %1552, %v2219_v8  }
 0x137   : > { %1555 = vset.pattern.permute.xlu0 %v1830_v42 }
 0x138   : > { %867 = vperm.xlu0 %1555, %v2201_v1  }
 0x13a   : > { %1553 = vset.pattern.permute.xlu1 %v1829_v17  ;;  %v2353_v17 = vld [vmem:[#allocation2 + $0x30] ss:$2 sm:$0xff] }
 0x13b   : > { %815 = vperm.xlu1 %1553, %v2201_v1   ;;  %v981_v1 = vld [vmem:[%s2187_s30 + $0xf8] sm:$0xff]  ;;  %1123 = vst.msk [vmem:[#allocation2 + $0x30] sm:$0x1] %vm1119_vm1, %v1828_v16 }
 0x13c   : > { %879 = vperm.xlu0 %1555, %v2205_v3   ;;  %v1055_v25 = vmax.f32 %v1039_v13, %v981_v1  ;;  %1132 = vst.msk [vmem:[#allocation2 + $0x31] sm:$0x7f] %vm1128_vm2, %v1114_v22  ;;  %v1052_v13 = vmax.f32 %v1036_v63, %v2304_v34 }
 0x13e   : > { %1071 = vst.msk [vmem:[#allocation2 + $0x78] sm:$0xff] %vm984_vm0, %v1055_v25  ;;  %1068 = vst.msk [vmem:[#allocation2 + $0x60] sm:$0xff] %vm984_vm0, %v1052_v13  ;;  %v536_v25 = vsub.s32 0, %v2420_v15 }
 0x13f   : > { %823 = vperm.xlu1 %1553, %v2199_v0  }
 0x140   : > { %887 = vperm.xlu0 %1555, %v2211_v5  }
 0x143   : > { %827 = vperm.xlu1 %1553, %v2205_v3   ;;  %v2368_v3 = vld [vmem:[#allocation2 + $0x51] ss:$2 sm:$0xff] }
 0x144   : > { %895 = vperm.xlu0 %1555, %v2217_v7   ;;  %1134 = vst.msk [vmem:[#allocation2 + $0x51] sm:$0x7f] %vm1128_vm2, %v1116_v39 }
 0x145   : > { %v2388_v52 = vld [vmem:[#allocation2 + $0x70] ss:$2 sm:$0xff]  ;;  %v2390_v24 = vld [vmem:[#allocation2 + $0x71] ss:$2 sm:$0xff] }
 0x146   : > { %v1118_v57 = vld [vmem:[#allocation2 + $0x71] ss:$2 sm:$0x7f]  ;;  %1127 = vst.msk [vmem:[#allocation2 + $0x70] sm:$0x1] %vm1119_vm1, %v1828_v16 }
 0x147   : > { %835 = vperm.xlu1 %1553, %v2211_v5   ;;  %v1048_v5 = vmax.f32 %v1032_v50, %v2288_v30  ;;  %v2398_v30 = vld [vmem:[#allocation2 + $0x10] ss:$2 sm:$0xff]  ;;  %1136 = vst.msk [vmem:[#allocation2 + $0x71] sm:$0x7f] %vm1128_vm2, %v1118_v57 }
 0x148   : > { %1121 = vst.msk [vmem:[#allocation2 + $0x10] sm:$0x1] %vm1119_vm1, %v1828_v16 }
 0x149   : > { %1064 = vst.msk [vmem:[#allocation2 + $0x40] sm:$0xff] %vm984_vm0, %v1048_v5 }
 0x14a   : > { %1130 = vst.msk [vmem:[#allocation2 + $0x11] sm:$0x7f] %vm1128_vm2, %v1112_v59 }
 0x14b   : > { %843 = vperm.xlu1 %1553, %v2217_v7   ;;  %v975_v7 = vld [vmem:[%s2187_s30 + $0xc8] sm:$0xff] }
 0x14c   : > { %v2394_v55 = vpop.permute.xlu1 %506  ;;  %v497_v56 = vpop.permute.xlu0 %496  ;;  %v1037_v2 = vmax.f32 %v1021_v62, %v975_v7 }
 0x14f   : > { %1556 = vset.pattern.permute.xlu1 %v1830_v42 }
 0x150   : > { %v512_v9 = vpop.permute.xlu1 %511  ;;  %871 = vperm.xlu1 %1556, %v2207_v4   ;;  %v502_v10 = vpop.permute.xlu0 %501  ;;  %v1053_v4 = vmax.f32 %v1037_v2, %v2307_v37  ;;  %v2428_v34 = vld [vmem:[#allocation2 + $0x40] ss:$2 sm:$0xff]  ;;  %v2431_v21 = vld [vmem:[#allocation2 + $0x41] ss:$2 sm:$0xff]  ;;  %v588_v37 = vsub.s32 1, %v2420_v15 }
 0x151   : > { %v1115_v22 = vld [vmem:[#allocation2 + $0x41] ss:$2 sm:$0x7f]  ;;  %1124 = vst.msk [vmem:[#allocation2 + $0x40] sm:$0x1] %vm1119_vm1, %v1828_v16 }
 0x152   : > { %1069 = vst.msk [vmem:[#allocation2 + $0x68] sm:$0xff] %vm984_vm0, %v1053_v4 }
 0x153   : > { %1133 = vst.msk [vmem:[#allocation2 + $0x41] sm:$0x7f] %vm1128_vm2, %v1115_v22 }
 0x154   : > { %v522_v19 = vpop.permute.xlu1 %521  ;;  %875 = vperm.xlu1 %1556, %v2199_v0   ;;  %v517_v20 = vpop.permute.xlu0 %516  ;;  %v2440_v0 = vld [vmem:[#allocation8] sm:$0xff] }
 0x155   : > { %v537_v29 = vrot.slane %v2440_v0, %v536_v25  ;;  %v589_v32 = vrot.slane %v2440_v0, %v588_v37 }
 0x157   : > { %v538_v39 = vmul.f32 %v537_v29, %v497_v56  ;;  %v539_v40 = vmul.f32 %v537_v29, %v502_v10  ;;  %v540_v54 = vmul.f32 %v537_v29, %v2394_v55  ;;  %v542_v7 = vmul.f32 %v537_v29, %v517_v20 }
 0x158   : > { %v532_v27 = vpop.permute.xlu1 %531  ;;  %883 = vperm.xlu1 %1556, %v2213_v6   ;;  %v527_v28 = vpop.permute.xlu0 %526  ;;  %v543_v62 = vmul.f32 %v537_v29, %v522_v19  ;;  %v640_v10 = vsub.s32 2, %v2420_v15 }
 0x159   : > { %v2447_v35 = vld [vmem:[#allocation2 + $0x60] ss:$2 sm:$0xff]  ;;  %v2449_v38 = vld [vmem:[#allocation2 + $0x61] ss:$2 sm:$0xff]  ;;  %v545_v25 = vmul.f32 %v537_v29, %v532_v27  ;;  %v544_v37 = vmul.f32 %v537_v29, %v527_v28 }
 0x15a   : > { %2795 = vst [vmem:[#allocation24_spill] sm:$0xff] %v2449_v38  ;;  %v1117_v43 = vld [vmem:[#allocation2 + $0x61] ss:$2 sm:$0x7f]  ;;  %1126 = vst.msk [vmem:[#allocation2 + $0x60] sm:$0x1] %vm1119_vm1, %v1828_v16 }
 0x15b   : > { %1135 = vst.msk [vmem:[#allocation2 + $0x61] sm:$0x7f] %vm1128_vm2, %v1117_v43 }
 0x15c   : > { %891 = vperm.xlu1 %1556, %v2219_v8   ;;  %v541_v8 = vmul.f32 %v537_v29, %v512_v9 }
 0x15d   : > { %v560_v6 = vpop.permute.xlu1 %559  ;;  %v556_v44 = vpop.permute.xlu0 %555 }
 0x15e   : > { %v591_v45 = vmul.f32 %v589_v32, %v560_v6  ;;  %v590_v46 = vmul.f32 %v589_v32, %v556_v44 }
 0x160   : > { %v599_v50 = vadd.f32 %v591_v45, %v539_v40  ;;  %v598_v23 = vadd.f32 %v590_v46, %v538_v39  ;;  %v641_v39 = vrot.slane %v2440_v0, %v640_v10 }
 0x161   : > { %v564_v5 = vpop.permute.xlu1 %563  ;;  %v568_v53 = vpop.permute.xlu0 %567 }
 0x162   : > { %v592_v56 = vmul.f32 %v589_v32, %v564_v5  ;;  %v593_v57 = vmul.f32 %v589_v32, %v568_v53 }
 0x164   : > { %v600_v16 = vadd.f32 %v592_v56, %v540_v54  ;;  %v601_v59 = vadd.f32 %v593_v57, %v541_v8 }
 0x165   : > { %v572_v31 = vpop.permute.xlu1 %571  ;;  %v576_v60 = vpop.permute.xlu0 %575 }
 0x166   : > { %v594_v63 = vmul.f32 %v589_v32, %v572_v31  ;;  %v595_v2 = vmul.f32 %v589_v32, %v576_v60 }
 0x168   : > { %v602_v13 = vadd.f32 %v594_v63, %v542_v7  ;;  %v603_v14 = vadd.f32 %v595_v2, %v543_v62 }
 0x169   : > { %v580_v4 = vpop.permute.xlu1 %579  ;;  %v584_v22 = vpop.permute.xlu0 %583 }
 0x16a   : > { %v596_v55 = vmul.f32 %v589_v32, %v580_v4  ;;  %v597_v9 = vmul.f32 %v589_v32, %v584_v22 }
 0x16c   : > { %v604_v20 = vadd.f32 %v596_v55, %v544_v37  ;;  %v605_v40 = vadd.f32 %v597_v9, %v545_v25 }
 0x16e   : > { %v608_v43 = vpop.permute.xlu1 %607  ;;  %v612_v6 = vpop.permute.xlu0 %611 }
 0x16f   : > { %v642_v44 = vmul.f32 %v641_v39, %v608_v43  ;;  %v643_v19 = vmul.f32 %v641_v39, %v612_v6 }
 0x171   : > { %v2460_v45 = vadd.f32 %v642_v44, %v598_v23  ;;  %v651_v46 = vadd.f32 %v643_v19, %v599_v50  ;;  %v692_v50 = vsub.s32 3, %v2420_v15 }
 0x172   : > { %v616_v5 = vpop.permute.xlu1 %615  ;;  %v624_v53 = vpop.permute.xlu0 %623 }
 0x173   : > { %v644_v54 = vmul.f32 %v641_v39, %v616_v5  ;;  %v646_v8 = vmul.f32 %v641_v39, %v624_v53 }
 0x175   : > { %v652_v56 = vadd.f32 %v644_v54, %v600_v16  ;;  %v654_v27 = vadd.f32 %v646_v8, %v602_v13  ;;  %v2470_v16 = vrot.slane %v2440_v0, %v692_v50 }
 0x176   : > { %v620_v28 = vpop.permute.xlu1 %619  ;;  %v632_v29 = vpop.permute.xlu0 %631 }
 0x177   : > { %v645_v32 = vmul.f32 %v641_v39, %v620_v28  ;;  %v648_v57 = vmul.f32 %v641_v39, %v632_v29 }
 0x179   : > { %v2462_v7 = vadd.f32 %v645_v32, %v601_v59  ;;  %v656_v31 = vadd.f32 %v648_v57, %v604_v20 }
 0x17a   : > { %v628_v60 = vpop.permute.xlu1 %627 }
 0x17b   : > { %v647_v62 = vmul.f32 %v641_v39, %v628_v60  ;;  %v660_v63 = vpop.permute.xlu0 %659 }
 0x17d   : > { %v2464_v2 = vadd.f32 %v647_v62, %v603_v14 }
 0x17e   : > { %v636_v23 = vpop.permute.xlu1 %635 }
 0x17f   : > { %v649_v10 = vmul.f32 %v641_v39, %v636_v23  ;;  %v672_v4 = vpop.permute.xlu0 %671 }
 0x181   : > { %v2467_v22 = vadd.f32 %v649_v10, %v605_v40  ;;  %v744_v10 = vsub.s32 4, %v2420_v15 }
 0x183   : > { %v664_v13 = vpop.permute.xlu1 %663  ;;  %v680_v25 = vpop.permute.xlu0 %679 }
 0x184   : > { %v695_v59 = vmul.f32 %v2470_v16, %v664_v13  ;;  %v796_v13 = vsub.s32 5, %v2420_v15 }
 0x186   : > { %v2473_v37 = vadd.f32 %v695_v59, %v651_v46 }
 0x187   : > { %v668_v55 = vpop.permute.xlu1 %667  ;;  %v2475_v9 = vpop.permute.xlu0 %687 }
 0x188   : > { %v696_v14 = vmul.f32 %v2470_v16, %v668_v55 }
 0x18a   : > { %v2478_v20 = vadd.f32 %v696_v14, %v652_v56  ;;  %v694_v14 = vmul.f32 %v2470_v16, %v660_v63 }
 0x18b   : > { %v676_v39 = vpop.permute.xlu1 %675 }
 0x18c   : > { %v698_v40 = vmul.f32 %v2470_v16, %v676_v39  ;;  %v2481_v43 = vpop.permute.xlu0 %715  ;;  %v2512_v39 = vrot.slane %v2440_v0, %v744_v10  ;;  %v702_v26 = vadd.f32 %v694_v14, %v2460_v45 }
 0x18e   : > { %v2483_v6 = vadd.f32 %v698_v40, %v654_v27  ;;  %v2515_v40 = vrot.slane %v2440_v0, %v796_v13  ;;  %v697_v13 = vmul.f32 %v2470_v16, %v672_v4 }
 0x18f   : > { %v684_v44 = vpop.permute.xlu1 %683 }
 0x190   : > { %v700_v19 = vmul.f32 %v2470_v16, %v684_v44  ;;  %v2486_v5 = vpop.permute.xlu0 %727  ;;  %v900_v44 = vsub.s32 7, %v2420_v15  ;;  %v705_v38 = vadd.f32 %v697_v13, %v2462_v7  ;;  %v1171_v7 = vld [vmem:[%s2197_s28] sm:$0xff] }
 0x192   : > { %v2488_v46 = vadd.f32 %v700_v19, %v656_v31  ;;  %v2525_v63 = vrot.slane %v2440_v0, %v900_v44  ;;  %v699_v44 = vmul.f32 %v2470_v16, %v680_v25 }
 0x194   : > { %v712_v53 = vpop.permute.xlu1 %711  ;;  %v2490_v54 = vpop.permute.xlu0 %735 }
 0x195   : > { %v746_v19 = vmul.f32 %v2512_v39, %v712_v53  ;;  %v2529_v53 = vrot.slane %v2440_v0, %v848_v47 }
 0x197   : > { %v754_v1 = vadd.f32 %v746_v19, %v702_v26  ;;  %v2796_v26 = vmax.f32 %v2322_v48, %v2324_v49  ;;  %v2540_v19 = vstv %s1418_s17  ;;  %v707_v48 = vadd.f32 %v699_v44, %v2464_v2  ;;  %v1142_v2 = vld [vmem:[#allocation2 + $0x50] sm:$0xff] }
 0x198   : > { %v2492_v8 = vpop.permute.xlu1 %719  ;;  %v701_v49 = vmul.f32 %v2470_v16, %v2475_v9 }
 0x199   : > { %v764_v56 = vpop.permute.xlu0 %763  ;;  %v1145_v0 = vmax.f32 %v2796_v26, %v1137_v51  ;;  %v2556_v51 = vstv %s932_s23 }
 0x19a   : > { %v798_v42 = vmul.f32 %v2515_v40, %v764_v56 }
 0x19c   : > { %v724_v28 = vpop.permute.xlu1 %723  ;;  %v806_v41 = vadd.f32 %v798_v42, %v754_v1  ;;  %v2545_v1 = vld [vmem:[%s2748_s3] ss:$0 sm:$0xff] }
 0x19d   : > { %v776_v29 = vpop.permute.xlu0 %775  ;;  %v749_v45 = vmul.f32 %v2512_v39, %v724_v28 }
 0x19e   : > { %v801_v28 = vmul.f32 %v2515_v40, %v776_v29 }
 0x19f   : > { %v757_v25 = vadd.f32 %v749_v45, %v705_v38 }
 0x1a0   : > { %v732_v32 = vpop.permute.xlu1 %731 }
 0x1a1   : > { %v784_v57 = vpop.permute.xlu0 %783  ;;  %v751_v47 = vmul.f32 %v2512_v39, %v732_v32  ;;  %v1155_v32 = vmul.f32 %v2540_v19, %v1145_v0  ;;  %v809_v16 = vadd.f32 %v801_v28, %v757_v25  ;;  %v709_v0 = vadd.f32 %v701_v49, %v2467_v22  ;;  %v1172_v22 = vld [vmem:[%s2197_s28 + $0x8] sm:$0xff] }
 0x1a2   : > { %v803_v38 = vmul.f32 %v2515_v40, %v784_v57  ;;  %v747_v25 = vmul.f32 %v2512_v39, %v2481_v43 }
 0x1a4   : > { %v740_v60 = vpop.permute.xlu1 %739 }
 0x1a5   : > { %v2494_v27 = vpop.permute.xlu0 %791  ;;  %v753_v29 = vmul.f32 %v2512_v39, %v740_v60  ;;  %v2797_v60 = vmax.f32 %v2353_v17, %v2355_v18 }
 0x1a9   : > { %v2496_v62 = vpop.permute.xlu1 %767 }
 0x1aa   : > { %v2498_v50 = vpop.permute.xlu0 %819 }
 0x1ad   : > { %v2500_v23 = vpop.permute.xlu1 %771 }
 0x1ae   : > { %v2502_v31 = vpop.permute.xlu0 %831 }
 0x1b1   : > { %v2506_v59 = vpop.permute.xlu1 %779 }
 0x1b2   : > { %v2508_v55 = vpop.permute.xlu0 %839 }
 0x1b5   : > { %v2520_v33 = vpop.permute.xlu1 %787 }
 0x1b7   : > { %v868_v10 = vpop.permute.xlu0 %867 }
 0x1b8   : > { %v902_v14 = vmul.f32 %v2525_v63, %v868_v10 }
 0x1ba   : > { %v816_v15 = vpop.permute.xlu1 %815 }
 0x1bb   : > { %v850_v56 = vmul.f32 %v2529_v53, %v816_v15  ;;  %v880_v61 = vpop.permute.xlu0 %879  ;;  %v759_v15 = vadd.f32 %v751_v47, %v707_v48 }
 0x1bc   : > { %v905_v26 = vmul.f32 %v2525_v63, %v880_v61  ;;  %v805_v61 = vmul.f32 %v2515_v40, %v2494_v27 }
 0x1bd   : > { %v858_v4 = vadd.f32 %v850_v56, %v806_v41  ;;  %v2551_v41 = vstv %s1419_s15  ;;  %v811_v28 = vadd.f32 %v803_v38, %v759_v15 }
 0x1be   : > { %v2547_v42 = vpop.permute.xlu1 %823  ;;  %v2563_v45 = vmul.f32 %v2551_v41, %v1171_v7  ;;  %v2593_v27 = vmul.f32 %v2551_v41, %v1172_v22  ;;  %v800_v22 = vmul.f32 %v2515_v40, %v2500_v23 }
 0x1bf   : > { %v910_v10 = vadd.f32 %v902_v14, %v858_v4  ;;  %v1140_v14 = vld [vmem:[#allocation2 + $0x30] sm:$0xff]  ;;  %v888_v44 = vpop.permute.xlu0 %887 }
 0x1c0   : > { %v1148_v7 = vmax.f32 %v2797_v60, %v1140_v14  ;;  %v907_v18 = vmul.f32 %v2525_v63, %v888_v44  ;;  %v1144_v14 = vld [vmem:[#allocation2 + $0x70] sm:$0xff]  ;;  %v1174_v60 = vld [vmem:[%s2197_s28 + $0x18] sm:$0xff] }
 0x1c1   : > { %v924_v13 = vadd.f32 %v2545_v1, %v910_v10  ;;  %v2798_v10 = vmax.f32 %v2366_v36, %v2368_v3  ;;  %v799_v36 = vmul.f32 %v2515_v40, %v2496_v62 }
 0x1c2   : > { %v828_v56 = vpop.permute.xlu1 %827  ;;  %v1158_v43 = vmul.f32 %v2540_v19, %v1148_v7 }
 0x1c3   : > { %v934_v9 = vmul.f32 %v2556_v51, %v924_v13  ;;  %v853_v4 = vmul.f32 %v2529_v53, %v828_v56  ;;  %v1150_v48 = vmax.f32 %v2798_v10, %v1142_v2  ;;  %v761_v13 = vadd.f32 %v753_v29, %v709_v0  ;;  %v896_v3 = vpop.permute.xlu0 %895  ;;  %v1138_v29 = vld [vmem:[#allocation2 + $0x10] sm:$0xff]  ;;  %v1173_v0 = vld [vmem:[%s2197_s28 + $0x10] sm:$0xff] }
 0x1c4   : > { %v755_v2 = vadd.f32 %v747_v25, %v2473_v37  ;;  %v909_v7 = vmul.f32 %v2525_v63, %v896_v3  ;;  %v748_v37 = vmul.f32 %v2512_v39, %v2492_v8  ;;  %v750_v25 = vmul.f32 %v2512_v39, %v2486_v5 }
 0x1c5   : > { %v1163_v57 = vadd.f32 %v1155_v32, %v934_v9  ;;  %v861_v47 = vadd.f32 %v853_v4, %v809_v16  ;;  %v813_v62 = vadd.f32 %v805_v61, %v761_v13  ;;  %v1160_v44 = vmul.f32 %v2540_v19, %v1150_v48 }
 0x1c6   : > { %v836_v49 = vpop.permute.xlu1 %835  ;;  %v2799_v9 = vmax.f32 %v2388_v52, %v2390_v24  ;;  %v807_v10 = vadd.f32 %v799_v36, %v755_v2  ;;  %v851_v48 = vmul.f32 %v2529_v53, %v2498_v50  ;;  %v2800_v52 = vmax.f32 %v2398_v30, %v2403_v58 }
 0x1c7   : > { %v1181_v32 = vadd.f32 %v2563_v45, %v1163_v57  ;;  %v913_v56 = vadd.f32 %v905_v26, %v861_v47  ;;  %v855_v17 = vmul.f32 %v2529_v53, %v836_v49  ;;  %v2619_v8 = vmul.f32 %v2551_v41, %v1173_v0 }
 0x1c8   : > { %v1152_v4 = vmax.f32 %v2799_v9, %v1144_v14  ;;  %v1146_v24 = vmax.f32 %v2800_v52, %v1138_v29  ;;  %v2623_v49 = vmul.f32 %v2551_v41, %v1174_v60  ;;  %v802_v30 = vmul.f32 %v2515_v40, %v2506_v59 }
 0x1c9   : > { %1189 = vst.msk [vmem:[%s2587_s19] sm:$0xff] %vm984_vm0, %v1181_v32  ;;  %v927_v15 = vadd.f32 %v2545_v1, %v913_v56  ;;  %v863_v38 = vadd.f32 %v855_v17, %v811_v28  ;;  %v1139_v17 = vld [vmem:[#allocation2 + $0x20] sm:$0xff]  ;;  %v756_v23 = vadd.f32 %v748_v37, %v2478_v20  ;;  %v852_v14 = vmul.f32 %v2529_v53, %v2547_v42 }
 0x1ca   : > { %v844_v16 = vpop.permute.xlu1 %843  ;;  %v1162_v50 = vmul.f32 %v2540_v19, %v1152_v4  ;;  %v758_v41 = vadd.f32 %v750_v25, %v2483_v6  ;;  %v2801_v42 = vmax.f32 %v2413_v11, %v2415_v12  ;;  %v854_v6 = vmul.f32 %v2529_v53, %v2502_v31 }
 0x1cb   : > { %v937_v26 = vmul.f32 %v2556_v51, %v927_v15  ;;  %v915_v57 = vadd.f32 %v907_v18, %v863_v38  ;;  %v857_v47 = vmul.f32 %v2529_v53, %v844_v16  ;;  %v859_v18 = vadd.f32 %v851_v48, %v807_v10 }
 0x1cc   : > { %v752_v15 = vmul.f32 %v2512_v39, %v2490_v54  ;;  %v808_v20 = vadd.f32 %v800_v22, %v756_v23  ;;  %v1147_v29 = vmax.f32 %v2801_v42, %v1139_v17  ;;  %v810_v2 = vadd.f32 %v802_v30, %v758_v41 }
 0x1cd   : > { %v1166_v28 = vadd.f32 %v1158_v43, %v937_v26  ;;  %v929_v13 = vadd.f32 %v2545_v1, %v915_v57  ;;  %v865_v61 = vadd.f32 %v857_v47, %v813_v62  ;;  %v1156_v43 = vmul.f32 %v2540_v19, %v1146_v24  ;;  %v1141_v26 = vld [vmem:[#allocation2 + $0x40] sm:$0xff] }
 0x1ce   : > { %v804_v9 = vmul.f32 %v2515_v40, %v2520_v33  ;;  %v860_v4 = vadd.f32 %v852_v14, %v808_v20  ;;  %v760_v12 = vadd.f32 %v752_v15, %v2488_v46  ;;  %v1157_v0 = vmul.f32 %v2540_v19, %v1147_v29  ;;  %v1143_v24 = vld [vmem:[#allocation2 + $0x60] sm:$0xff] }
 0x1cf   : > { %v1184_v58 = vadd.f32 %v2593_v27, %v1166_v28  ;;  %v939_v5 = vmul.f32 %v2556_v51, %v929_v13  ;;  %v917_v32 = vadd.f32 %v909_v7, %v865_v61  ;;  %v872_v56 = vpop.permute.xlu1 %871  ;;  %v862_v47 = vadd.f32 %v854_v6, %v810_v2 }
 0x1d0   : > { %v903_v36 = vmul.f32 %v2525_v63, %v872_v56  ;;  %v856_v33 = vmul.f32 %v2529_v53, %v2508_v55  ;;  %v2802_v60 = vmax.f32 %v2428_v34, %v2431_v21  ;;  %v812_v10 = vadd.f32 %v804_v9, %v760_v12  ;;  %v2803_v21 = vld [vmem:[#allocation24_spill] sm:$0xff] }
 0x1d1   : > { %1192 = vst.msk [vmem:[%s2587_s19 + $0x18] sm:$0xff] %vm984_vm0, %v1184_v58  ;;  %v1168_v59 = vadd.f32 %v1160_v44, %v939_v5  ;;  %v931_v3 = vadd.f32 %v2545_v1, %v917_v32  ;;  %v2804_v28 = vmax.f32 %v2447_v35, %v2803_v21 }
 0x1d2   : > { %v911_v38 = vadd.f32 %v903_v36, %v859_v18  ;;  %v1149_v7 = vmax.f32 %v2802_v60, %v1141_v26  ;;  %v864_v22 = vadd.f32 %v856_v33, %v812_v10 }
 0x1d3   : > { %v1186_v62 = vadd.f32 %v2619_v8, %v1168_v59  ;;  %v941_v44 = vmul.f32 %v2556_v51, %v931_v3  ;;  %v876_v16 = vpop.permute.xlu1 %875  ;;  %v1151_v13 = vmax.f32 %v2804_v28, %v1143_v24 }
 0x1d4   : > { %v925_v54 = vadd.f32 %v2545_v1, %v911_v38  ;;  %v904_v39 = vmul.f32 %v2525_v63, %v876_v16  ;;  %v1159_v34 = vmul.f32 %v2540_v19, %v1149_v7 }
 0x1d5   : > { %1194 = vst.msk [vmem:[%s2587_s19 + $0x28] sm:$0xff] %vm984_vm0, %v1186_v62  ;;  %v1170_v11 = vadd.f32 %v1162_v50, %v941_v44  ;;  %v1161_v56 = vmul.f32 %v2540_v19, %v1151_v13 }
 0x1d6   : > { %v935_v31 = vmul.f32 %v2556_v51, %v925_v54  ;;  %v912_v57 = vadd.f32 %v904_v39, %v860_v4 }
 0x1d7   : > { %v1188_v40 = vadd.f32 %v2623_v49, %v1170_v11  ;;  %v884_v37 = vpop.permute.xlu1 %883 }
 0x1d8   : > { %v1164_v48 = vadd.f32 %v1156_v43, %v935_v31  ;;  %v926_v46 = vadd.f32 %v2545_v1, %v912_v57  ;;  %v906_v52 = vmul.f32 %v2525_v63, %v884_v37 }
 0x1d9   : > { %1196 = vst.msk [vmem:[%s2587_s19 + $0x38] sm:$0xff] %vm984_vm0, %v1188_v40 }
 0x1da   : > { %v1182_v55 = vadd.f32 %v2563_v45, %v1164_v48  ;;  %v936_v53 = vmul.f32 %v2556_v51, %v926_v46  ;;  %v914_v25 = vadd.f32 %v906_v52, %v862_v47 }
 0x1db   : > { %v892_v61 = vpop.permute.xlu1 %891 }
 0x1dc   : > { %1190 = vst.msk [vmem:[%s2587_s19 + $0x8] sm:$0xff] %vm984_vm0, %v1182_v55  ;;  %v1165_v50 = vadd.f32 %v1157_v0, %v936_v53  ;;  %v928_v30 = vadd.f32 %v2545_v1, %v914_v25  ;;  %v908_v45 = vmul.f32 %v2525_v63, %v892_v61 }
 0x1de   : > { %v1183_v58 = vadd.f32 %v2593_v27, %v1165_v50  ;;  %v938_v5 = vmul.f32 %v2556_v51, %v928_v30  ;;  %v916_v35 = vadd.f32 %v908_v45, %v864_v22 }
 0x1e0   : > { %1191 = vst.msk [vmem:[%s2587_s19 + $0x10] sm:$0xff] %vm984_vm0, %v1183_v58  ;;  %v1167_v32 = vadd.f32 %v1159_v34, %v938_v5  ;;  %v930_v17 = vadd.f32 %v2545_v1, %v916_v35 }
 0x1e2   : > { %v1185_v23 = vadd.f32 %v2619_v8, %v1167_v32  ;;  %v940_v18 = vmul.f32 %v2556_v51, %v930_v17 }
 0x1e4   : > { %1193 = vst.msk [vmem:[%s2587_s19 + $0x20] sm:$0xff] %vm984_vm0, %v1185_v23  ;;  %v1169_v63 = vadd.f32 %v1161_v56, %v940_v18 }
 0x1e6   : > { %v1187_v19 = vadd.f32 %v2623_v49, %v1169_v63 }
 0x1e8   : > { %1195 = vst.msk [vmem:[%s2587_s19 + $0x30] sm:$0xff] %vm984_vm0, %v1187_v19 }
 0x1e9   : > { %1731 = shalt.err (!%p1728_p2)
}
 0x1ea   : > { %s1732_s30 = scalar_lea.hbm %s2691_s18, 1024  ;;  %s1736_s11 = scalar_lea.hbm %s2752_s7, 2048 }
 0x1eb   : > { %p1733_p9 = scmp.ne.s32.totalorder %s2691_s18, %s1732_s30  ;;  %p1737_p7 = scmp.lt.u32.totalorder %s2691_s18, %s2752_s7 }
 0x1ec   : > { %p1738_p0 = scmp.lt.u32.totalorder %s1736_s11, %s1732_s30  ;;  %p1740_p8 = scmp.lt.u32.totalorder %s1732_s30, %s2691_s18 }
 0x1ed   : > { %p1734_p13 = pnand %p1733_p9, %p2805_p12 }
 0x1ee   : > { %p1739_p4 = por %p1738_p0, %p1737_p7 }
 0x1ef   : > { %p1735_p6 = pneg %p1734_p13 }
 0x1f0   : > { %p1741_p5 = por %p1740_p8, %p1739_p4 }
 0x1f2   : > { %p1742_p3 = pnand %p1741_p5, %p1735_p6 }
 0x1f4   : > { %1745 = shalt.err (!%p1742_p3)
}
 0x1f5   : > { %s1832_s15 = smov 128   ;;  %s1833_s23 = smov 8  }
 0x1f6   : > { %1446 = dma.vmem_to_hbm [thread:$0]  (%p2805_p12), %s2693_s16, 1024, %s2691_s18, %s1198_s29, %s1832_s15, %s1832_s15, %s1833_s23  }
 0x1f7 PF: > { %s2806_s20 = sld [smem:[#allocation21_spill]]  ;;  %s1228_s1 = sand.u32 1, %s1792_s24  }
 0x1f8   : > { %p2807_p10 = scmp.ne.s32.totalorder %s2784_s9, 0  ;;  %s1229_s19 = scalar_lea.sflag [#allocation5], %s1228_s1 }
 0x1fd   : > { %p2808_p11 = scmp.ge.s32.totalorder %s2806_s20, 2 }
 0x1ff   : > { %p1469_p1 = pnand %p2808_p11, %p2807_p10 }
 0x201   : > { %1787 = dma.done.wait (!%p1469_p1), %s1229_s19, 1024  }
 0x202   : > { %1789 = vsyncadd (!%p1469_p1), %s1229_s19, 4294966272  ;;  %s25_s29 = sadd.s32 1, %s2806_s20   ;;  %s2809_s13 = sld [smem:[#allocation19_spill]] }
 0x203   : > { %p22_p2 = scmp.ge.s32.totalorder %s25_s29, 4   ;;  %s2810_s26 = sld [smem:[#allocation23_spill]] }
 0x204   : > { %s2811_s27 = sld [smem:[#allocation20_spill]]  ;;  %s2812_s28 = sld [smem:[#allocation22_spill]] }
 0x205   : > { %s2813_s24 = smov %s1796_s25  ;;  %24 = sbr.rel (!%p22_p2) target bundleno = 12 (0xc), region = 155 }
 0x208   : > { %s2814_s25 = smov %s2809_s13 }
 0x20c   :  { %1234 = vsyncpa [#allocation4], 1 }
 0x20d   :  { %1236 = vsyncpa [#allocation4 + $0x1], 1 }
 0x20e   :  { %1237 = vsyncpa [#allocation9], 1 }
 0x20f   :  { %1238 = vsyncpa [#allocation5], 1 }
 0x210   :  { %1240 = vsyncpa [#allocation5 + $0x1], 1 }
 0x211   :  { %1241 = vsyncpa [#allocation6], 1 }
 0x212   :  { %1243 = vsyncpa [#allocation6 + $0x1], 1 }

</bundles_post_ra>
